<compile_context>
chip_gen: v7x
topology: tpu7x:2x2x1
jax: 0.10.0
libtpu: 0.0.40
codegen_flags: <defaults>
</compile_context>

<pallas_src>
import jax
import jax.numpy as jnp
from jax.experimental import pallas as pl
from jax.experimental.pallas import tpu as pltpu

LANES = 128                          # tokens packed per lane-dense output row
MXU_MAX_D = 128                      # block-diagonal MXU path for D <= this
TARGET_TILE_BYTES = 8 * 1024 * 1024  # useful x streamed per grid step
MIN_GRID_STEPS = 4                   # >= 2 steps per TensorCore on dual-TC v7x


def _round_up(n, m):
    return ((n + m - 1) // m) * m


def _vmem_budget_bytes():
    """Generation-aware VMEM budget: ~70% of physical (v5e/v6e 128 MiB, v7x 64 MiB)."""
    cap = 128 * 1024 * 1024
    try:
        info = pltpu.get_tpu_info()
        cap = int(getattr(info, "vmem_capacity_bytes", cap))
    except Exception:
        pass
    return int(cap * 0.7)


def _choose_row_tile(rows, hbm_row_bytes, vmem_row_bytes, weight_bytes, vmem_budget):
    """Rows (of 128 packed tokens) per grid step: multiple of 8, exact VMEM sizing."""
    if rows <= 8:
        return rows                                    # single block == full array dims
    per_row = 2 * vmem_row_bytes + 2 * LANES * 4       # dbl-buffered x + dbl-buffered out
    avail = max(vmem_budget - 2 * weight_bytes - (2 << 20), 8 * per_row)
    rt_vmem = max(8, (avail // per_row) // 8 * 8)
    rt_target = max(8, (TARGET_TILE_BYTES // hbm_row_bytes) // 8 * 8)
    rt_steps = _round_up(pl.cdiv(rows, MIN_GRID_STEPS), 8)   # keep the grid shardable
    return min(rt_vmem, rt_target, rt_steps, _round_up(rows, 8))


def _row_pad(a, min_rows):
    """Pad the leading dim up to min_rows with zeros (only hit for < 1024 tokens)."""
    r = a.shape[0]
    if r >= min_rows:
        return a
    return jnp.zeros((min_rows,) + a.shape[1:], a.dtype).at[:r].set(a)


def _block_diag_weight(weight, d):
    """(128*D, 128) f32: column t holds w in rows t*D .. t*D+D-1, zeros elsewhere.

    (row_tile, 128*D) @ W_bd computes the per-token dot product on the MXU with a
    lane-dense (row_tile, 128) result (token t of each packed row -> output lane t).
    """
    w = jnp.asarray(weight, jnp.float32).reshape(d)
    eye = jnp.eye(LANES, dtype=jnp.float32)
    return (eye[:, None, :] * w[None, :, None]).reshape(LANES * d, LANES)


# ----------------------------- kernels ---------------------------------------


def _mask_kernel_mxu(x_ref, w_ref, nb_ref, o_ref):
    # x_ref: (row_tile, 128*D) native dtype       w_ref: (128*D, 128) f32 (resident)
    # nb_ref: (1, 1) f32 in SMEM (= -bias)        o_ref: (row_tile, 128) f32 lane-dense
    z = jnp.dot(x_ref[...].astype(jnp.float32), w_ref[...],
                preferred_element_type=jnp.float32)
    # sigmoid((z + b) / T) >= 0.5  <=>  z >= -b  (T > 0): no divide, no EUP, no add.
    o_ref[...] = (z >= nb_ref[0, 0]).astype(o_ref.dtype)


def _mask_kernel_vpu(x_ref, w_ref, nb_ref, o_ref):
    # Fallback for D > 128 (near HBM-bound there): D on lanes, VPU mul + lane reduce.
    z = jnp.sum(x_ref[...].astype(jnp.float32) * w_ref[...], axis=-1)
    o_ref[...] = (z >= nb_ref[0, 0]).astype(o_ref.dtype)


# ----------------------------- pallas_call wrappers ---------------------------


def _mask_call_mxu(x_packed, w_bd, neg_b, vmem_budget):
    rows, k = x_packed.shape                       # k == 128 * D
    itemsize = x_packed.dtype.itemsize
    row_tile = _choose_row_tile(rows, k * itemsize, k * itemsize,
                                w_bd.size * 4, vmem_budget)
    grid = (pl.cdiv(rows, row_tile),)
    cost = pl.CostEstimate(
        flops=2 * rows * k * LANES, transcendentals=0,
        bytes_accessed=rows * k * itemsize + w_bd.size * 4 + rows * LANES * 4)
    return pl.pallas_call(
        _mask_kernel_mxu,
        out_shape=jax.ShapeDtypeStruct((rows, LANES), jnp.float32),
        grid_spec=pltpu.PrefetchScalarGridSpec(
            num_scalar_prefetch=0,
            grid=grid,
            in_specs=[
                pl.BlockSpec((row_tile, k), lambda i: (i, 0)),       # streamed packed x
                pl.BlockSpec((k, LANES), lambda i: (0, 0)),          # resident weight
                pl.BlockSpec(memory_space=pltpu.MemorySpace.SMEM),   # -bias scalar
            ],
            out_specs=pl.BlockSpec((row_tile, LANES), lambda i: (i, 0)),
        ),
        compiler_params=pltpu.CompilerParams(
            dimension_semantics=("parallel",),       # shards grid across v7x's 2 TCs
            vmem_limit_bytes=vmem_budget,
        ),
        cost_estimate=cost,
    )(x_packed, w_bd, neg_b)


def _mask_call_vpu(x3, w3, neg_b, vmem_budget):
    rows, lanes, d = x3.shape
    itemsize = x3.dtype.itemsize
    row_tile = _choose_row_tile(
        rows,
        hbm_row_bytes=lanes * d * itemsize,
        vmem_row_bytes=lanes * _round_up(d, LANES) * itemsize,   # lane-padding aware
        weight_bytes=_round_up(d, LANES) * 4 * 8,
        vmem_budget=vmem_budget)
    # TODO(synk): for very large D (>~4k) a D-split grid axis with an accumulator
    # would be needed to bound the per-step VMEM footprint.
    grid = (pl.cdiv(rows, row_tile),)
    return pl.pallas_call(
        _mask_kernel_vpu,
        out_shape=jax.ShapeDtypeStruct((rows, lanes), jnp.float32),
        grid_spec=pltpu.PrefetchScalarGridSpec(
            num_scalar_prefetch=0,
            grid=grid,
            in_specs=[
                pl.BlockSpec((row_tile, lanes, d), lambda i: (i, 0, 0)),
                pl.BlockSpec((1, 1, d), lambda i: (0, 0, 0)),
                pl.BlockSpec(memory_space=pltpu.MemorySpace.SMEM),
            ],
            out_specs=pl.BlockSpec((row_tile, lanes), lambda i: (i, 0)),
        ),
        compiler_params=pltpu.CompilerParams(
            dimension_semantics=("parallel",),
            vmem_limit_bytes=vmem_budget,
        ),
    )(x3, w3, neg_b)


# ----------------------------- module forward ---------------------------------


def _device_forward(x, weight, bias):
    """Jittable device-side forward: hard mask, permutation idx, num_keep."""
    B, N, D = x.shape
    M = B * N
    vmem_budget = _vmem_budget_bytes()

    x_flat = x.reshape(M, D)                                # free contiguous view
    neg_b = -jnp.asarray(bias, jnp.float32).reshape(1, 1)   # threshold for z >= -b

    use_mxu = D <= MXU_MAX_D
    if use_mxu:
        w_op = _block_diag_weight(weight, D)                # (128*D, 128) f32
    else:
        w_op = jnp.asarray(weight, jnp.float32).reshape(1, 1, D)

    rows_main = M // LANES
    rem = M - rows_main * LANES

    pieces = []
    if rows_main > 0:
        # When M % 128 == 0 this is a pure bitcast view: zero extra HBM traffic.
        # TODO(synk): when M % 128 != 0 XLA materializes the prefix slice (one extra
        # HBM pass over the prefix); a fully copy-free ragged path would need
        # per-batch (B, N*D) packing or a manual-DMA (pl.ANY) kernel.
        x_main = x_flat if rem == 0 else x_flat[: rows_main * LANES]
        if use_mxu:
            slab = _mask_call_mxu(_row_pad(x_main.reshape(rows_main, LANES * D), 8),
                                  w_op, neg_b, vmem_budget)
        else:
            slab = _mask_call_vpu(_row_pad(x_main.reshape(rows_main, LANES, D), 8),
                                  w_op, neg_b, vmem_budget)
        pieces.append(slab.reshape(-1)[: rows_main * LANES])
    if rem > 0:
        # Ragged tail (< 128 tokens): tiny zero-padded slab through the same kernel.
        tail = jnp.zeros((8 * LANES, D), x.dtype).at[:rem].set(x_flat[rows_main * LANES:])
        if use_mxu:
            tslab = _mask_call_mxu(tail.reshape(8, LANES * D), w_op, neg_b, vmem_budget)
        else:
            tslab = _mask_call_vpu(tail.reshape(8, LANES, D), w_op, neg_b, vmem_budget)
        # Padded tokens are discarded here, so they never affect hard / num_keep.
        pieces.append(tslab.reshape(-1)[:rem])

    hard_flat = pieces[0] if len(pieces) == 1 else jnp.concatenate(pieces)
    hard = hard_flat.reshape(B, N, 1)

    # Stable partition == stable descending argsort of a 0/1 score, without a sort.
    keep = hard_flat > 0.5
    keep_i = keep.astype(jnp.int32)
    num_keep = jnp.sum(keep_i)
    pos_keep = jnp.cumsum(keep_i) - 1
    pos_drop = num_keep + jnp.cumsum(1 - keep_i) - 1
    dest = jnp.where(keep, pos_keep, pos_drop)
    idx = jnp.zeros((M,), jnp.int32).at[dest].set(jnp.arange(M, dtype=jnp.int32))
    return hard, idx.reshape(1, M), num_keep


_device_forward_jit = jax.jit(_device_forward)


def adaptive_mask_forward(x, weight, bias):
    """Eval-mode AdaptiveMask forward: returns (hard, [idx1, idx2])."""
    hard, idx, num_keep = _device_forward_jit(x, weight, bias)
    # TODO(synk): idx1/idx2 have data-dependent shapes, so one host sync on
    # num_keep is unavoidable to reproduce the module's return signature.
    nk = int(num_keep)
    return hard, [idx[:, :nk], idx[:, nk:]]


if __name__ == "__main__":
    key = jax.random.PRNGKey(0)
    D = 32
    kx1, kx2, kw, kb = jax.random.split(key, 4)

    # Deterministic nn.Linear(dim, 1)-style init: U(-1/sqrt(D), 1/sqrt(D)).
    bound = 1.0 / (D ** 0.5)
    weight = jax.random.uniform(kw, (D, 1), jnp.float32, -bound, bound)
    bias = jax.random.uniform(kb, (1,), jnp.float32, -bound, bound)

    # Shape 1: B*N a multiple of 128 (zero-copy packed fast path).
    # Shape 2: ragged token count (exercises the tiny tail-slab path).
    for (B, N), kx in (((2, 192), kx1), ((2, 200), kx2)):
        x = jax.random.normal(kx, (B, N, D), dtype=jnp.float32)
        hard, (idx1, idx2) = adaptive_mask_forward(x, weight, bias)
        hard, idx1, idx2 = jax.block_until_ready((hard, idx1, idx2))

        # --- correctness checks against a pure-JAX reference ---
        assert hard.shape == (B, N, 1)
        soft_ref = (x.reshape(-1, D) @ weight.reshape(D, 1)).reshape(-1) + bias[0]
        hard_ref = (jax.nn.sigmoid(soft_ref / (2.0 / 3.0)) >= 0.5).astype(jnp.float32)
        got = hard.reshape(-1)
        # Exact match except (possibly) tokens whose pre-activation is within float
        # rounding of 0 (different f32 accumulation order kernel vs. XLA reference).
        disagree = got != hard_ref
        assert bool(jnp.all(~disagree | (jnp.abs(soft_ref) < 1e-5)))

        # idx1/idx2 must be the stable descending argsort split of the returned hard.
        idx_ref = jnp.argsort(-got)                   # stable in JAX
        nk = int(jnp.sum(got))
        assert idx1.shape == (1, nk) and idx2.shape == (1, B * N - nk)
        assert bool(jnp.all(idx1[0] == idx_ref[:nk]))
        assert bool(jnp.all(idx2[0] == idx_ref[nk:]))

    print("KERNEL_OK")
</pallas_src>

<mosaic_0001>
module attributes {stable_mosaic.version = 11 : i64} {
  func.func @_mask_kernel_mxu(%arg0: i32, %arg1: memref<8x4096xf32, #tpu.memory_space<vmem>>, %arg2: memref<4096x128xf32, #tpu.memory_space<vmem>>, %arg3: memref<1x1xf32, #tpu.memory_space<smem>>, %arg4: memref<8x128xf32, #tpu.memory_space<vmem>>) attributes {dimension_semantics = [#tpu.dimension_semantics<parallel>], iteration_bounds = array<i64: 1>, scalar_prefetch = 0 : i64, scratch_operands = 0 : i64, tpu.core_type = #tpu.core_type<tc>, window_params = [{transform_indices = @transform_0, window_bounds = array<i64: 8, 4096>}, {pipeline_mode = #tpu.pipeline_mode<synchronous>, transform_indices = @transform_1, window_bounds = array<i64: 4096, 128>}, {transform_indices = @transform_2, window_bounds = array<i64: 1, 1>}, {transform_indices = @transform_3, window_bounds = array<i64: 8, 128>}]} {
    %c0 = arith.constant 0 : index
    %c0_0 = arith.constant 0 : index
    %0 = vector.load %arg1[%c0, %c0_0] : memref<8x4096xf32, #tpu.memory_space<vmem>>, vector<8x4096xf32>
    %c0_1 = arith.constant 0 : index
    %c0_2 = arith.constant 0 : index
    %1 = vector.load %arg2[%c0_1, %c0_2] : memref<4096x128xf32, #tpu.memory_space<vmem>>, vector<4096x128xf32>
    %cst = arith.constant dense<0.000000e+00> : vector<8x128xf32>
    %2 = tpu.matmul %0, %1, %cst {dimension_numbers = #tpu.dot_dimension_numbers<[1], [0], [0], [1], [0, 0, 1, 1], [], []>} : vector<8x4096xf32>, vector<4096x128xf32>, vector<8x128xf32> -> vector<8x128xf32>
    %c0_3 = arith.constant 0 : index
    %c0_4 = arith.constant 0 : index
    %3 = memref.load %arg3[%c0_3, %c0_4] : memref<1x1xf32, #tpu.memory_space<smem>>
    %4 = vector.broadcast %3 : f32 to vector<8x128xf32>
    %5 = arith.cmpf oge, %2, %4 : vector<8x128xf32>
    %6 = arith.extui %5 : vector<8x128xi1> to vector<8x128xi32>
    %7 = arith.sitofp %6 : vector<8x128xi32> to vector<8x128xf32>
    %c0_5 = arith.constant 0 : index
    %c0_6 = arith.constant 0 : index
    %8 = vector.load %arg4[%c0_5, %c0_6] : memref<8x128xf32, #tpu.memory_space<vmem>>, vector<8x128xf32>
    tpu.vector_store %arg4[%c0_5, %c0_6], %7 {strides = array<i32>} : memref<8x128xf32, #tpu.memory_space<vmem>>, vector<8x128xf32>,
    return
  }
  func.func @transform_0(%arg0: i32) -> (i32, i32) {
    %c0_i32 = arith.constant 0 : i32
    %c0_i32_0 = arith.constant 0 : i32
    return %arg0, %c0_i32 : i32, i32
  }
  func.func @transform_1(%arg0: i32) -> (i32, i32) {
    %c0_i32 = arith.constant 0 : i32
    %c0_i32_0 = arith.constant 0 : i32
    %c0_i32_1 = arith.constant 0 : i32
    return %c0_i32, %c0_i32_0 : i32, i32
  }
  func.func @transform_2(%arg0: i32) -> (i32, i32) {
    %c0_i32 = arith.constant 0 : i32
    %c0_i32_0 = arith.constant 0 : i32
    %c0_i32_1 = arith.constant 0 : i32
    return %c0_i32, %c0_i32_0 : i32, i32
  }
  func.func @transform_3(%arg0: i32) -> (i32, i32) {
    %c0_i32 = arith.constant 0 : i32
    %c0_i32_0 = arith.constant 0 : i32
    return %arg0, %c0_i32 : i32, i32
  }
}

</mosaic_0001>

<bundles_post_ra>
// kernel: _device_forward.1
= control target key start
LH: loop header
LB: loop body
LE: loop exit
PB: predicated region body
PF: predicated region fallthrough
CT: control target
= control target key end

     0   :  { %9 = vsyncpa [#allocation4], 0  ;;  %s2951_s0 = inlined_call_operand.hbm [shape: f32[8,4096], index: 0, kind: input, shape index: {}]   ;;  %s2952_s1 = inlined_call_operand.hbm [shape: f32[4096,128], index: 1, kind: input, shape index: {}]   ;;  %s2953_s2 = inlined_call_operand.<no memory space> [shape: f32[1,1], index: 2, kind: input, shape index: {}]   ;;  %s2954_s3 = inlined_call_operand.hbm [shape: f32[8,128], index: 3, kind: output, shape index: {}]  }
   0x1   :  { %10 = vsyncpa [#allocation7], 0 }
   0x2   :  { %11 = vsyncpa [#allocation5], 0  ;;  %s2879_s12 = smov [#allocation3]   ;;  %s2880_s14 = smov [#allocation6]  }
   0x3   :  { %s18_s13 = sshll.u32 %s2879_s12, 4  ;;  %s27_s15 = sshll.u32 %s2880_s14, 4  ;;  %s19_s13 = int_to_ptr.vmem [resolvable:$true] %s18_s13  ;;  %s2905_s15 = int_to_ptr.vmem [resolvable:$true] %s27_s15 }
   0x4   :  { %s2807_s18 = scalar_lea.hbm %s2951_s0, 4096 }
   0x5   :  { %p2808_p0 = scmp.ne.s32.totalorder %s2951_s0, %s2807_s18  ;;  %p2811_p1 = scmp.lt.u32.totalorder %s2807_s18, %s2951_s0 }
   0x7   :  { %p2813_p2 = pnand %p2811_p1, %p2808_p0 }
   0x9   :  { %2816 = shalt.err (!%p2813_p2)
}
   0xa   :  { %s2817_s23 = scalar_lea.vmem %s19_s13, 4096  ;;  %p2822_p4 = scmp.lt.s32.totalorder %s19_s13, %s19_s13 }
   0xb   :  { %p2818_p3 = scmp.ne.s32.totalorder %s19_s13, %s2817_s23  ;;  %p2823_p5 = scmp.lt.s32.totalorder %s2817_s23, %s2817_s23 }
   0xd   :  { %p2824_p6 = por %p2823_p5, %p2822_p4 }
   0xf   :  { %p2825_p7 = pnand %p2824_p6, %p2818_p3 }
  0x11   :  { %2828 = shalt.err (!%p2825_p7)
}
  0x12   :  { %21 = dma.hbm_to_vmem [thread:$0]  %s2951_s0, 4096, %s19_s13, [#allocation4]  }
  0x13   :  { %s2829_s28 = scalar_lea.hbm %s2952_s1, 65536 }
  0x14   :  { %p2830_p8 = scmp.ne.s32.totalorder %s2952_s1, %s2829_s28  ;;  %p2833_p9 = scmp.lt.u32.totalorder %s2829_s28, %s2952_s1 }
  0x16   :  { %p2835_p10 = pnand %p2833_p9, %p2830_p8 }
  0x18   :  { %2838 = shalt.err (!%p2835_p10)
}
  0x19   :  { %s2839_s6 = scalar_lea.vmem %s2905_s15, 65536  ;;  %p2844_p12 = scmp.lt.s32.totalorder %s2905_s15, %s2905_s15 }
  0x1a   :  { %p2840_p11 = scmp.ne.s32.totalorder %s2905_s15, %s2839_s6  ;;  %p2845_p13 = scmp.lt.s32.totalorder %s2839_s6, %s2839_s6 }
  0x1c   :  { %p2846_p0 = por %p2845_p13, %p2844_p12 }
  0x1e   :  { %p2847_p1 = pnand %p2846_p0, %p2840_p11 }
  0x20   :  { %2850 = shalt.err (!%p2847_p1)
}
  0x21   :  { %s2881_s0 = smov 128   ;;  %s2882_s7 = smov 8  }
  0x22   :  { %33 = dma.hbm_to_vmem [thread:$0]  %s2952_s1, 65536, %s2905_s15, [#allocation7], %s2881_s0, %s2881_s0, %s2882_s7  }
  0x23   :  { %2873 = dma.done.wait [#allocation4], 4096  }
  0x24   :  { %2874 = vsyncadd [#allocation4], 4294963200 }
  0x25   :  { %2875 = dma.done.wait [#allocation7], 65536  }
  0x26   :  { %2876 = vsyncadd [#allocation7], 4294901760  ;;  %v90_v0 = vld [vmem:[#allocation6 + $0x80] sm:$0xff]  ;;  %v91_v1 = vld [vmem:[#allocation6 + $0x88] sm:$0xff]  ;;  %s2883_s11 = smov [#allocation8]  }
  0x27   :  { %v122_v2 = vld [vmem:[#allocation6 + $0x180] sm:$0xff]  ;;  %v2289_v3 = vpack.c.bf16 %v91_v1, %v90_v0  ;;  %v123_v4 = vld [vmem:[#allocation6 + $0x188] sm:$0xff]  ;;  %v92_v11 = vld [vmem:[#allocation6 + $0x90] sm:$0xff]  ;;  %s1718_s12 = sshll.u32 %s2883_s11, 4  ;;  %s1719_s12 = int_to_ptr.vmem [resolvable:$true] %s1718_s12 }
  0x28   :  { %v74_v5 = vld [vmem:[#allocation6] sm:$0xff]  ;;  %v75_v6 = vld [vmem:[#allocation6 + $0x8] sm:$0xff]  ;;  %v2321_v7 = vpack.c.bf16 %v123_v4, %v122_v2  ;;  %v93_v13 = vld [vmem:[#allocation6 + $0x98] sm:$0xff]  ;;  %s2851_s13 = scalar_lea.vmem %s1719_s12, 128  ;;  %p2856_p3 = scmp.lt.s32.totalorder %s1719_s12, %s1719_s12 }
  0x29   :  { %v2291_v8 = vpack.c.bf16 %v75_v6, %v74_v5  ;;  %v106_v9 = vld [vmem:[#allocation6 + $0x100] sm:$0xff]  ;;  %v107_v10 = vld [vmem:[#allocation6 + $0x108] sm:$0xff]  ;;  %2290 = vmatprep.subr.bf16.mxu0 %v2289_v3  ;;  %v124_v14 = vld [vmem:[#allocation6 + $0x190] sm:$0xff]  ;;  %v2293_v16 = vpack.c.bf16 %v93_v13, %v92_v11  ;;  %p2852_p2 = scmp.ne.s32.totalorder %s1719_s12, %s2851_s13  ;;  %p2857_p4 = scmp.lt.s32.totalorder %s2851_s13, %s2851_s13 }
  0x2a   :  { %v2323_v12 = vpack.c.bf16 %v107_v10, %v106_v9  ;;  %v125_v15 = vld [vmem:[#allocation6 + $0x198] sm:$0xff]  ;;  %2322 = vmatprep.subr.bf16.mxu1 %v2321_v7  ;;  %v76_v18 = vld [vmem:[#allocation6 + $0x10] sm:$0xff]  ;;  %v94_v23 = vld [vmem:[#allocation6 + $0xa0] sm:$0xff] }
  0x2b   :  { %2292 = vmatpush3.bf16.msra.mxu0 %v2291_v8  ;;  %v2325_v17 = vpack.c.bf16 %v125_v15, %v124_v14  ;;  %v77_v19 = vld [vmem:[#allocation6 + $0x18] sm:$0xff]  ;;  %v108_v20 = vld [vmem:[#allocation6 + $0x110] sm:$0xff]  ;;  %v95_v24 = vld [vmem:[#allocation6 + $0xa8] sm:$0xff]  ;;  %p2858_p5 = por %p2857_p4, %p2856_p3 }
  0x2c   :  { %2324 = vmatpush3.bf16.msra.mxu1 %v2323_v12  ;;  %v2295_v21 = vpack.c.bf16 %v77_v19, %v76_v18  ;;  %v109_v22 = vld [vmem:[#allocation6 + $0x118] sm:$0xff]  ;;  %2294 = vmatprep.subr.bf16.mxu0 %v2293_v16  ;;  %v2297_v26 = vpack.c.bf16 %v95_v24, %v94_v23  ;;  %v126_v27 = vld [vmem:[#allocation6 + $0x1a0] sm:$0xff]  ;;  %v127_v28 = vld [vmem:[#allocation6 + $0x1a8] sm:$0xff] }
  0x2d   :  { %2326 = vmatprep.subr.bf16.mxu1 %v2325_v17  ;;  %v2327_v25 = vpack.c.bf16 %v109_v22, %v108_v20  ;;  %v78_v29 = vld [vmem:[#allocation6 + $0x20] sm:$0xff]  ;;  %v2329_v30 = vpack.c.bf16 %v127_v28, %v126_v27  ;;  %v79_v31 = vld [vmem:[#allocation6 + $0x28] sm:$0xff]  ;;  %v96_v35 = vld [vmem:[#allocation6 + $0xb0] sm:$0xff]  ;;  %p2859_p6 = pnand %p2858_p5, %p2852_p2 }
  0x2e   :  { %v110_v32 = vld [vmem:[#allocation6 + $0x120] sm:$0xff]  ;;  %v111_v33 = vld [vmem:[#allocation6 + $0x128] sm:$0xff]  ;;  %v2299_v34 = vpack.c.bf16 %v79_v31, %v78_v29  ;;  %v97_v36 = vld [vmem:[#allocation6 + $0xb8] sm:$0xff] }
  0x2f   :  { %2296 = vmatpush3.bf16.msra.mxu0 %v2295_v21  ;;  %v128_v37 = vld [vmem:[#allocation6 + $0x1b0] sm:$0xff]  ;;  %v2331_v38 = vpack.c.bf16 %v111_v33, %v110_v32  ;;  %v2301_v39 = vpack.c.bf16 %v97_v36, %v96_v35  ;;  %v129_v40 = vld [vmem:[#allocation6 + $0x1b8] sm:$0xff]  ;;  %v98_v46 = vld [vmem:[#allocation6 + $0xc0] sm:$0xff] }
  0x30   :  { %2328 = vmatpush3.bf16.msra.mxu1 %v2327_v25  ;;  %2298 = vmatprep.subr.bf16.mxu0 %v2297_v26  ;;  %v80_v41 = vld [vmem:[#allocation6 + $0x30] sm:$0xff]  ;;  %v81_v42 = vld [vmem:[#allocation6 + $0x38] sm:$0xff]  ;;  %v2333_v43 = vpack.c.bf16 %v129_v40, %v128_v37  ;;  %v99_v47 = vld [vmem:[#allocation6 + $0xc8] sm:$0xff] }
  0x31   :  { %2330 = vmatprep.subr.bf16.mxu1 %v2329_v30  ;;  %v112_v44 = vld [vmem:[#allocation6 + $0x130] sm:$0xff]  ;;  %v113_v45 = vld [vmem:[#allocation6 + $0x138] sm:$0xff]  ;;  %v130_v48 = vld [vmem:[#allocation6 + $0x1c0] sm:$0xff]  ;;  %v2303_v50 = vpack.c.bf16 %v81_v42, %v80_v41  ;;  %v2305_v52 = vpack.c.bf16 %v99_v47, %v98_v46 }
  0x32   :  { %v131_v49 = vld [vmem:[#allocation6 + $0x1c8] sm:$0xff]  ;;  %v2335_v51 = vpack.c.bf16 %v113_v45, %v112_v44  ;;  %v82_v53 = vld [vmem:[#allocation6 + $0x40] sm:$0xff]  ;;  %v100_v58 = vld [vmem:[#allocation6 + $0xd0] sm:$0xff] }
  0x33   :  { %2300 = vmatpush3.bf16.msra.mxu0 %v2299_v34  ;;  %v83_v54 = vld [vmem:[#allocation6 + $0x48] sm:$0xff]  ;;  %v114_v55 = vld [vmem:[#allocation6 + $0x140] sm:$0xff]  ;;  %v2337_v56 = vpack.c.bf16 %v131_v49, %v130_v48  ;;  %v101_v59 = vld [vmem:[#allocation6 + $0xd8] sm:$0xff] }
  0x34   :  { %2332 = vmatpush3.bf16.msra.mxu1 %v2331_v38  ;;  %2302 = vmatprep.subr.bf16.mxu0 %v2301_v39  ;;  %v115_v57 = vld [vmem:[#allocation6 + $0x148] sm:$0xff]  ;;  %v132_v60 = vld [vmem:[#allocation6 + $0x1d0] sm:$0xff]  ;;  %v133_v61 = vld [vmem:[#allocation6 + $0x1d8] sm:$0xff]  ;;  %v2307_v62 = vpack.c.bf16 %v83_v54, %v82_v53  ;;  %v2309_v0 = vpack.c.bf16 %v101_v59, %v100_v58 }
  0x35   :  { %2334 = vmatprep.subr.bf16.mxu1 %v2333_v43  ;;  %v2339_v63 = vpack.c.bf16 %v115_v57, %v114_v55  ;;  %v84_v1 = vld [vmem:[#allocation6 + $0x50] sm:$0xff]  ;;  %v85_v2 = vld [vmem:[#allocation6 + $0x58] sm:$0xff]  ;;  %v2341_v4 = vpack.c.bf16 %v133_v61, %v132_v60  ;;  %v102_v6 = vld [vmem:[#allocation6 + $0xe0] sm:$0xff] }
  0x36   :  { %v116_v3 = vld [vmem:[#allocation6 + $0x150] sm:$0xff]  ;;  %v117_v5 = vld [vmem:[#allocation6 + $0x158] sm:$0xff]  ;;  %v103_v7 = vld [vmem:[#allocation6 + $0xe8] sm:$0xff]  ;;  %v2311_v10 = vpack.c.bf16 %v85_v2, %v84_v1 }
  0x37   :  { %2304 = vmatpush3.bf16.msra.mxu0 %v2303_v50  ;;  %v134_v8 = vld [vmem:[#allocation6 + $0x1e0] sm:$0xff]  ;;  %v135_v9 = vld [vmem:[#allocation6 + $0x1e8] sm:$0xff]  ;;  %v2343_v13 = vpack.c.bf16 %v117_v5, %v116_v3  ;;  %v2313_v14 = vpack.c.bf16 %v103_v7, %v102_v6  ;;  %v45_v17 = vld [vmem:[#allocation3 + $0x18] sm:$0xff] }
  0x38   :  { %2336 = vmatpush3.bf16.msra.mxu1 %v2335_v51  ;;  %2306 = vmatprep.subr.bf16.mxu0 %v2305_v52  ;;  %v86_v11 = vld [vmem:[#allocation6 + $0x60] sm:$0xff]  ;;  %v87_v12 = vld [vmem:[#allocation6 + $0x68] sm:$0xff]  ;;  %v2345_v18 = vpack.c.bf16 %v135_v9, %v134_v8  ;;  %v104_v20 = vld [vmem:[#allocation6 + $0xf0] sm:$0xff] }
  0x39   :  { %2338 = vmatprep.subr.bf16.mxu1 %v2337_v56  ;;  %v118_v15 = vld [vmem:[#allocation6 + $0x160] sm:$0xff]  ;;  %v43_v16 = vld [vmem:[#allocation3 + $0x8] sm:$0xff]  ;;  %v105_v21 = vld [vmem:[#allocation6 + $0xf8] sm:$0xff]  ;;  %720 = vmatprep.mubr.f32.mxu1 %v45_v17  ;;  %v2315_v24 = vpack.c.bf16 %v87_v12, %v86_v11 }
  0x3a   :  { %v119_v19 = vld [vmem:[#allocation6 + $0x168] sm:$0xff]  ;;  %650 = vmatprep.mubr.f32.mxu0 %v43_v16  ;;  %v136_v22 = vld [vmem:[#allocation6 + $0x1f0] sm:$0xff]  ;;  %v137_v23 = vld [vmem:[#allocation6 + $0x1f8] sm:$0xff]  ;;  %v2317_v26 = vpack.c.bf16 %v105_v21, %v104_v20 }
  0x3b   :  { %2308 = vmatpush3.bf16.msra.mxu0 %v2307_v62  ;;  %v2347_v25 = vpack.c.bf16 %v119_v19, %v118_v15  ;;  %v88_v27 = vld [vmem:[#allocation6 + $0x70] sm:$0xff]  ;;  %v89_v28 = vld [vmem:[#allocation6 + $0x78] sm:$0xff]  ;;  %v2349_v30 = vpack.c.bf16 %v137_v23, %v136_v22  ;;  %v154_v32 = vld [vmem:[#allocation6 + $0x280] sm:$0xff] }
  0x3c   :  { %2340 = vmatpush3.bf16.msra.mxu1 %v2339_v63  ;;  %2310 = vmatprep.subr.bf16.mxu0 %v2309_v0  ;;  %v120_v29 = vld [vmem:[#allocation6 + $0x170] sm:$0xff]  ;;  %v121_v31 = vld [vmem:[#allocation6 + $0x178] sm:$0xff]  ;;  %v155_v33 = vld [vmem:[#allocation6 + $0x288] sm:$0xff]  ;;  %v2319_v36 = vpack.c.bf16 %v89_v28, %v88_v27 }
  0x3d   :  { %2342 = vmatprep.subr.bf16.mxu1 %v2341_v4  ;;  %v186_v34 = vld [vmem:[#allocation6 + $0x380] sm:$0xff]  ;;  %v187_v35 = vld [vmem:[#allocation6 + $0x388] sm:$0xff]  ;;  %v2351_v37 = vpack.c.bf16 %v121_v31, %v120_v29  ;;  %v2353_v38 = vpack.c.bf16 %v155_v33, %v154_v32  ;;  %v156_v44 = vld [vmem:[#allocation6 + $0x290] sm:$0xff] }
  0x3e   :  { %v138_v39 = vld [vmem:[#allocation6 + $0x200] sm:$0xff]  ;;  %v139_v40 = vld [vmem:[#allocation6 + $0x208] sm:$0xff]  ;;  %v2385_v42 = vpack.c.bf16 %v187_v35, %v186_v34  ;;  %v157_v45 = vld [vmem:[#allocation6 + $0x298] sm:$0xff] }
  0x3f   :  { %2312 = vmatpush3.bf16.msra.mxu0 %v2311_v10  ;;  %v170_v41 = vld [vmem:[#allocation6 + $0x300] sm:$0xff]  ;;  %v171_v43 = vld [vmem:[#allocation6 + $0x308] sm:$0xff]  ;;  %v188_v46 = vld [vmem:[#allocation6 + $0x390] sm:$0xff]  ;;  %v2355_v50 = vpack.c.bf16 %v139_v40, %v138_v39  ;;  %v2357_v52 = vpack.c.bf16 %v157_v45, %v156_v44 }
  0x40   :  { %2344 = vmatpush3.bf16.msra.mxu1 %v2343_v13  ;;  %2314 = vmatprep.subr.bf16.mxu0 %v2313_v14  ;;  %v189_v47 = vld [vmem:[#allocation6 + $0x398] sm:$0xff]  ;;  %v42_v48 = vld [vmem:[#allocation3] sm:$0xff]  ;;  %v44_v49 = vld [vmem:[#allocation3 + $0x10] sm:$0xff]  ;;  %v2387_v51 = vpack.c.bf16 %v171_v43, %v170_v41 }
  0x41   :  { %2346 = vmatprep.subr.bf16.mxu1 %v2345_v18  ;;  %v140_v53 = vld [vmem:[#allocation6 + $0x210] sm:$0xff]  ;;  %v141_v54 = vld [vmem:[#allocation6 + $0x218] sm:$0xff]  ;;  %v2389_v56 = vpack.c.bf16 %v189_v47, %v188_v46  ;;  %v158_v58 = vld [vmem:[#allocation6 + $0x2a0] sm:$0xff] }
  0x42   :  { %v172_v55 = vld [vmem:[#allocation6 + $0x310] sm:$0xff]  ;;  %v173_v57 = vld [vmem:[#allocation6 + $0x318] sm:$0xff]  ;;  %v159_v59 = vld [vmem:[#allocation6 + $0x2a8] sm:$0xff]  ;;  %v2359_v62 = vpack.c.bf16 %v141_v54, %v140_v53 }
  0x43   :  { %2316 = vmatpush3.bf16.msra.mxu0 %v2315_v24  ;;  %v190_v60 = vld [vmem:[#allocation6 + $0x3a0] sm:$0xff]  ;;  %v191_v61 = vld [vmem:[#allocation6 + $0x3a8] sm:$0xff]  ;;  %v2391_v63 = vpack.c.bf16 %v173_v57, %v172_v55  ;;  %v2361_v0 = vpack.c.bf16 %v159_v59, %v158_v58  ;;  %v160_v6 = vld [vmem:[#allocation6 + $0x2b0] sm:$0xff] }
  0x44   :  { %2348 = vmatpush3.bf16.msra.mxu1 %v2347_v25  ;;  %2318 = vmatprep.subr.bf16.mxu0 %v2317_v26  ;;  %v142_v1 = vld [vmem:[#allocation6 + $0x220] sm:$0xff]  ;;  %v143_v2 = vld [vmem:[#allocation6 + $0x228] sm:$0xff]  ;;  %v2393_v4 = vpack.c.bf16 %v191_v61, %v190_v60  ;;  %v161_v7 = vld [vmem:[#allocation6 + $0x2b8] sm:$0xff] }
  0x45   :  { %2350 = vmatprep.subr.bf16.mxu1 %v2349_v30  ;;  %v174_v3 = vld [vmem:[#allocation6 + $0x320] sm:$0xff]  ;;  %v175_v5 = vld [vmem:[#allocation6 + $0x328] sm:$0xff]  ;;  %v192_v8 = vld [vmem:[#allocation6 + $0x3b0] sm:$0xff]  ;;  %v2363_v10 = vpack.c.bf16 %v143_v2, %v142_v1  ;;  %v2365_v12 = vpack.c.bf16 %v161_v7, %v160_v6 }
  0x46   :  { %v193_v9 = vld [vmem:[#allocation6 + $0x3b8] sm:$0xff]  ;;  %v2395_v11 = vpack.c.bf16 %v175_v5, %v174_v3  ;;  %v144_v13 = vld [vmem:[#allocation6 + $0x230] sm:$0xff]  ;;  %v162_v18 = vld [vmem:[#allocation6 + $0x2c0] sm:$0xff] }
  0x47   :  { %2320 = vmatpush3.bf16.msra.mxu0 %v2319_v36  ;;  %v145_v14 = vld [vmem:[#allocation6 + $0x238] sm:$0xff]  ;;  %v176_v15 = vld [vmem:[#allocation6 + $0x330] sm:$0xff]  ;;  %v2397_v16 = vpack.c.bf16 %v193_v9, %v192_v8  ;;  %v163_v19 = vld [vmem:[#allocation6 + $0x2c8] sm:$0xff] }
  0x48   :  { %2352 = vmatpush3.bf16.msra.mxu1 %v2351_v37  ;;  %2354 = vmatprep.subr.bf16.mxu0 %v2353_v38  ;;  %v177_v17 = vld [vmem:[#allocation6 + $0x338] sm:$0xff]  ;;  %v194_v20 = vld [vmem:[#allocation6 + $0x3c0] sm:$0xff]  ;;  %v195_v21 = vld [vmem:[#allocation6 + $0x3c8] sm:$0xff]  ;;  %v2367_v22 = vpack.c.bf16 %v145_v14, %v144_v13  ;;  %v2369_v26 = vpack.c.bf16 %v163_v19, %v162_v18 }
  0x49   :  { %2386 = vmatprep.subr.bf16.mxu1 %v2385_v42  ;;  %v146_v23 = vld [vmem:[#allocation6 + $0x240] sm:$0xff]  ;;  %v47_v24 = vld [vmem:[#allocation3 + $0x28] sm:$0xff]  ;;  %v2399_v25 = vpack.c.bf16 %v177_v17, %v176_v15  ;;  %v49_v29 = vld [vmem:[#allocation3 + $0x38] sm:$0xff]  ;;  %v2401_v30 = vpack.c.bf16 %v195_v21, %v194_v20 }
  0x4a   :  { %651 = vmatmul.mubr.f32.vlgmr.msra.gmra.mrb[0].mxu0 %v42_v48  ;;  %v147_v27 = vld [vmem:[#allocation6 + $0x248] sm:$0xff]  ;;  %v178_v28 = vld [vmem:[#allocation6 + $0x340] sm:$0xff]  ;;  %v164_v32 = vld [vmem:[#allocation6 + $0x2d0] sm:$0xff] }
  0x4b   :  { %721 = vmatmul.mubr.f32.vlgmr.msra.gmra.mrb[0].mxu1 %v44_v49  ;;  %2356 = vmatpush3.bf16.msra.mxu0 %v2355_v50  ;;  %v179_v31 = vld [vmem:[#allocation6 + $0x348] sm:$0xff]  ;;  %v165_v33 = vld [vmem:[#allocation6 + $0x2d8] sm:$0xff]  ;;  %v196_v34 = vld [vmem:[#allocation6 + $0x3d0] sm:$0xff]  ;;  %v2371_v36 = vpack.c.bf16 %v147_v27, %v146_v23 }
  0x4c   :  { %2388 = vmatpush3.bf16.msra.mxu1 %v2387_v51  ;;  %2358 = vmatprep.subr.bf16.mxu0 %v2357_v52  ;;  %v197_v35 = vld [vmem:[#allocation6 + $0x3d8] sm:$0xff]  ;;  %v2403_v37 = vpack.c.bf16 %v179_v31, %v178_v28  ;;  %v2373_v38 = vpack.c.bf16 %v165_v33, %v164_v32  ;;  %v148_v39 = vld [vmem:[#allocation6 + $0x250] sm:$0xff]  ;;  %v166_v44 = vld [vmem:[#allocation6 + $0x2e0] sm:$0xff] }
  0x4d   :  { %2390 = vmatprep.subr.bf16.mxu1 %v2389_v56  ;;  %790 = vmatprep.mubr.f32.mxu0 %v47_v24  ;;  %v149_v40 = vld [vmem:[#allocation6 + $0x258] sm:$0xff]  ;;  %v180_v41 = vld [vmem:[#allocation6 + $0x350] sm:$0xff]  ;;  %v2405_v42 = vpack.c.bf16 %v197_v35, %v196_v34  ;;  %v167_v45 = vld [vmem:[#allocation6 + $0x2e8] sm:$0xff] }
  0x4e   :  { %860 = vmatprep.mubr.f32.mxu1 %v49_v29  ;;  %v181_v43 = vld [vmem:[#allocation6 + $0x358] sm:$0xff]  ;;  %v198_v46 = vld [vmem:[#allocation6 + $0x3e0] sm:$0xff]  ;;  %v199_v47 = vld [vmem:[#allocation6 + $0x3e8] sm:$0xff]  ;;  %v2375_v48 = vpack.c.bf16 %v149_v40, %v148_v39  ;;  %v2377_v50 = vpack.c.bf16 %v167_v45, %v166_v44 }
  0x4f   :  { %2360 = vmatpush3.bf16.msra.mxu0 %v2359_v62  ;;  %v2407_v49 = vpack.c.bf16 %v181_v43, %v180_v41  ;;  %v150_v51 = vld [vmem:[#allocation6 + $0x260] sm:$0xff]  ;;  %v151_v52 = vld [vmem:[#allocation6 + $0x268] sm:$0xff]  ;;  %v2409_v54 = vpack.c.bf16 %v199_v47, %v198_v46  ;;  %v168_v56 = vld [vmem:[#allocation6 + $0x2f0] sm:$0xff] }
  0x50   :  { %2392 = vmatpush3.bf16.msra.mxu1 %v2391_v63  ;;  %2362 = vmatprep.subr.bf16.mxu0 %v2361_v0  ;;  %v182_v53 = vld [vmem:[#allocation6 + $0x360] sm:$0xff]  ;;  %v183_v55 = vld [vmem:[#allocation6 + $0x368] sm:$0xff]  ;;  %v169_v57 = vld [vmem:[#allocation6 + $0x2f8] sm:$0xff]  ;;  %v2379_v60 = vpack.c.bf16 %v151_v52, %v150_v51 }
  0x51   :  { %2394 = vmatprep.subr.bf16.mxu1 %v2393_v4  ;;  %v200_v58 = vld [vmem:[#allocation6 + $0x3f0] sm:$0xff]  ;;  %v201_v59 = vld [vmem:[#allocation6 + $0x3f8] sm:$0xff]  ;;  %v2411_v61 = vpack.c.bf16 %v183_v55, %v182_v53  ;;  %v2381_v62 = vpack.c.bf16 %v169_v57, %v168_v56  ;;  %v218_v4 = vld [vmem:[#allocation6 + $0x480] sm:$0xff] }
  0x52   :  { %v152_v63 = vld [vmem:[#allocation6 + $0x270] sm:$0xff]  ;;  %v153_v0 = vld [vmem:[#allocation6 + $0x278] sm:$0xff]  ;;  %v2413_v2 = vpack.c.bf16 %v201_v59, %v200_v58  ;;  %v219_v5 = vld [vmem:[#allocation6 + $0x488] sm:$0xff] }
  0x53   :  { %2364 = vmatpush3.bf16.msra.mxu0 %v2363_v10  ;;  %v184_v1 = vld [vmem:[#allocation6 + $0x370] sm:$0xff]  ;;  %v185_v3 = vld [vmem:[#allocation6 + $0x378] sm:$0xff]  ;;  %v250_v6 = vld [vmem:[#allocation6 + $0x580] sm:$0xff]  ;;  %v2383_v8 = vpack.c.bf16 %v153_v0, %v152_v63  ;;  %v2417_v10 = vpack.c.bf16 %v219_v5, %v218_v4 }
  0x54   :  { %2396 = vmatpush3.bf16.msra.mxu1 %v2395_v11  ;;  %2366 = vmatprep.subr.bf16.mxu0 %v2365_v12  ;;  %v251_v7 = vld [vmem:[#allocation6 + $0x588] sm:$0xff]  ;;  %v2415_v9 = vpack.c.bf16 %v185_v3, %v184_v1  ;;  %v202_v11 = vld [vmem:[#allocation6 + $0x400] sm:$0xff]  ;;  %v221_v17 = vld [vmem:[#allocation6 + $0x498] sm:$0xff] }
  0x55   :  { %2398 = vmatprep.subr.bf16.mxu1 %v2397_v16  ;;  %v203_v12 = vld [vmem:[#allocation6 + $0x408] sm:$0xff]  ;;  %v234_v13 = vld [vmem:[#allocation6 + $0x500] sm:$0xff]  ;;  %v2449_v14 = vpack.c.bf16 %v251_v7, %v250_v6  ;;  %v220_v16 = vld [vmem:[#allocation6 + $0x490] sm:$0xff] }
  0x56   :  { %v235_v15 = vld [vmem:[#allocation6 + $0x508] sm:$0xff]  ;;  %v252_v18 = vld [vmem:[#allocation6 + $0x590] sm:$0xff]  ;;  %v253_v19 = vld [vmem:[#allocation6 + $0x598] sm:$0xff]  ;;  %v2419_v21 = vpack.c.bf16 %v203_v12, %v202_v11  ;;  %v2421_v24 = vpack.c.bf16 %v221_v17, %v220_v16 }
  0x57   :  { %2368 = vmatpush3.bf16.msra.mxu0 %v2367_v22  ;;  %v46_v20 = vld [vmem:[#allocation3 + $0x20] sm:$0xff]  ;;  %v48_v22 = vld [vmem:[#allocation3 + $0x30] sm:$0xff]  ;;  %v2451_v23 = vpack.c.bf16 %v235_v15, %v234_v13  ;;  %v2453_v28 = vpack.c.bf16 %v253_v19, %v252_v18  ;;  %v237_v29 = vld [vmem:[#allocation6 + $0x518] sm:$0xff] }
  0x58   :  { %2400 = vmatpush3.bf16.msra.mxu1 %v2399_v25  ;;  %2370 = vmatprep.subr.bf16.mxu0 %v2369_v26  ;;  %v204_v25 = vld [vmem:[#allocation6 + $0x410] sm:$0xff]  ;;  %v205_v26 = vld [vmem:[#allocation6 + $0x418] sm:$0xff]  ;;  %v223_v31 = vld [vmem:[#allocation6 + $0x4a8] sm:$0xff] }
  0x59   :  { %2402 = vmatprep.subr.bf16.mxu1 %v2401_v30  ;;  %v236_v27 = vld [vmem:[#allocation6 + $0x510] sm:$0xff]  ;;  %v222_v30 = vld [vmem:[#allocation6 + $0x4a0] sm:$0xff]  ;;  %v255_v33 = vld [vmem:[#allocation6 + $0x5a8] sm:$0xff]  ;;  %v2423_v35 = vpack.c.bf16 %v205_v26, %v204_v25 }
  0x5a   :  { %v254_v32 = vld [vmem:[#allocation6 + $0x5a0] sm:$0xff]  ;;  %v51_v34 = vld [vmem:[#allocation3 + $0x48] sm:$0xff]  ;;  %v224_v44 = vld [vmem:[#allocation6 + $0x4b0] sm:$0xff] }
  0x5b   :  { %2372 = vmatpush3.bf16.msra.mxu0 %v2371_v36  ;;  %v53_v36 = vld [vmem:[#allocation3 + $0x58] sm:$0xff]  ;;  %v206_v39 = vld [vmem:[#allocation6 + $0x420] sm:$0xff]  ;;  %v207_v40 = vld [vmem:[#allocation6 + $0x428] sm:$0xff] }
  0x5c   :  { %2404 = vmatpush3.bf16.msra.mxu1 %v2403_v37  ;;  %2374 = vmatprep.subr.bf16.mxu0 %v2373_v38  ;;  %v2455_v37 = vpack.c.bf16 %v237_v29, %v236_v27  ;;  %v2425_v38 = vpack.c.bf16 %v223_v31, %v222_v30  ;;  %v238_v41 = vld [vmem:[#allocation6 + $0x520] sm:$0xff]  ;;  %v239_v43 = vld [vmem:[#allocation6 + $0x528] sm:$0xff]  ;;  %v225_v45 = vld [vmem:[#allocation6 + $0x4b8] sm:$0xff] }
  0x5d   :  { %2406 = vmatprep.subr.bf16.mxu1 %v2405_v42  ;;  %v2457_v42 = vpack.c.bf16 %v255_v33, %v254_v32  ;;  %v256_v46 = vld [vmem:[#allocation6 + $0x5b0] sm:$0xff]  ;;  %v257_v47 = vld [vmem:[#allocation6 + $0x5b8] sm:$0xff]  ;;  %v226_v56 = vld [vmem:[#allocation6 + $0x4c0] sm:$0xff] }
  0x5e   :  { %v208_v51 = vld [vmem:[#allocation6 + $0x430] sm:$0xff]  ;;  %v209_v52 = vld [vmem:[#allocation6 + $0x438] sm:$0xff]  ;;  %v227_v57 = vld [vmem:[#allocation6 + $0x4c8] sm:$0xff] }
  0x5f   :  { %2376 = vmatpush3.bf16.msra.mxu0 %v2375_v48  ;;  %v2427_v48 = vpack.c.bf16 %v207_v40, %v206_v39  ;;  %v240_v53 = vld [vmem:[#allocation6 + $0x530] sm:$0xff]  ;;  %v241_v55 = vld [vmem:[#allocation6 + $0x538] sm:$0xff]  ;;  %v258_v58 = vld [vmem:[#allocation6 + $0x5c0] sm:$0xff] }
  0x60   :  { %2408 = vmatpush3.bf16.msra.mxu1 %v2407_v49  ;;  %2378 = vmatprep.subr.bf16.mxu0 %v2377_v50  ;;  %v2459_v49 = vpack.c.bf16 %v239_v43, %v238_v41  ;;  %v2429_v50 = vpack.c.bf16 %v225_v45, %v224_v44  ;;  %v259_v59 = vld [vmem:[#allocation6 + $0x5c8] sm:$0xff]  ;;  %v210_v63 = vld [vmem:[#allocation6 + $0x440] sm:$0xff]  ;;  %v228_v4 = vld [vmem:[#allocation6 + $0x4d0] sm:$0xff] }
  0x61   :  { %2410 = vmatprep.subr.bf16.mxu1 %v2409_v54  ;;  %v2461_v54 = vpack.c.bf16 %v257_v47, %v256_v46  ;;  %v211_v0 = vld [vmem:[#allocation6 + $0x448] sm:$0xff]  ;;  %v242_v1 = vld [vmem:[#allocation6 + $0x540] sm:$0xff]  ;;  %v229_v5 = vld [vmem:[#allocation6 + $0x4d8] sm:$0xff] }
  0x62   :  { %v243_v3 = vld [vmem:[#allocation6 + $0x548] sm:$0xff]  ;;  %v260_v6 = vld [vmem:[#allocation6 + $0x5d0] sm:$0xff]  ;;  %v261_v7 = vld [vmem:[#allocation6 + $0x5d8] sm:$0xff] }
  0x63   :  { %2380 = vmatpush3.bf16.msra.mxu0 %v2379_v60  ;;  %v2431_v60 = vpack.c.bf16 %v209_v52, %v208_v51  ;;  %v212_v11 = vld [vmem:[#allocation6 + $0x450] sm:$0xff]  ;;  %v213_v12 = vld [vmem:[#allocation6 + $0x458] sm:$0xff]  ;;  %v230_v16 = vld [vmem:[#allocation6 + $0x4e0] sm:$0xff] }
  0x64   :  { %2412 = vmatpush3.bf16.msra.mxu1 %v2411_v61  ;;  %2382 = vmatprep.subr.bf16.mxu0 %v2381_v62  ;;  %v2463_v61 = vpack.c.bf16 %v241_v55, %v240_v53  ;;  %v2433_v62 = vpack.c.bf16 %v227_v57, %v226_v56  ;;  %v244_v13 = vld [vmem:[#allocation6 + $0x550] sm:$0xff]  ;;  %v245_v15 = vld [vmem:[#allocation6 + $0x558] sm:$0xff]  ;;  %v231_v17 = vld [vmem:[#allocation6 + $0x4e8] sm:$0xff] }
  0x65   :  { %2414 = vmatprep.subr.bf16.mxu1 %v2413_v2  ;;  %v2465_v2 = vpack.c.bf16 %v259_v59, %v258_v58  ;;  %v262_v18 = vld [vmem:[#allocation6 + $0x5e0] sm:$0xff]  ;;  %v263_v19 = vld [vmem:[#allocation6 + $0x5e8] sm:$0xff]  ;;  %v233_v29 = vld [vmem:[#allocation6 + $0x4f8] sm:$0xff] }
  0x66   :  { %v246_v25 = vld [vmem:[#allocation6 + $0x560] sm:$0xff]  ;;  %v2473_v26 = vpack.c.bf16 %v263_v19, %v262_v18  ;;  %v247_v27 = vld [vmem:[#allocation6 + $0x568] sm:$0xff]  ;;  %v264_v30 = vld [vmem:[#allocation6 + $0x5f0] sm:$0xff] }
  0x67   :  { %2384 = vmatpush3.bf16.msra.mxu0 %v2383_v8  ;;  %v2435_v8 = vpack.c.bf16 %v211_v0, %v210_v63  ;;  %v265_v31 = vld [vmem:[#allocation6 + $0x5f8] sm:$0xff]  ;;  %v2475_v33 = vpack.c.bf16 %v247_v27, %v246_v25  ;;  %v282_v40 = vld [vmem:[#allocation6 + $0x680] sm:$0xff]  ;;  %v283_v41 = vld [vmem:[#allocation6 + $0x688] sm:$0xff] }
  0x68   :  { %2416 = vmatpush3.bf16.msra.mxu1 %v2415_v9  ;;  %2418 = vmatprep.subr.bf16.mxu0 %v2417_v10  ;;  %v2467_v9 = vpack.c.bf16 %v243_v3, %v242_v1  ;;  %v2437_v10 = vpack.c.bf16 %v229_v5, %v228_v4  ;;  %v249_v39 = vld [vmem:[#allocation6 + $0x578] sm:$0xff]  ;;  %v315_v43 = vld [vmem:[#allocation6 + $0x788] sm:$0xff]  ;;  %v2481_v46 = vpack.c.bf16 %v283_v41, %v282_v40  ;;  %v266_v47 = vld [vmem:[#allocation6 + $0x600] sm:$0xff] }
  0x69   :  { %2450 = vmatprep.subr.bf16.mxu1 %v2449_v14  ;;  %v2469_v14 = vpack.c.bf16 %v261_v7, %v260_v6  ;;  %v299_v51 = vld [vmem:[#allocation6 + $0x708] sm:$0xff]  ;;  %v284_v52 = vld [vmem:[#allocation6 + $0x690] sm:$0xff]  ;;  %v285_v53 = vld [vmem:[#allocation6 + $0x698] sm:$0xff] }
  0x6a   :  { %791 = vmatmul.mubr.f32.vlgmr.msra.gmra.mrb[2].mxu0 %v46_v20  ;;  %v2439_v20 = vpack.c.bf16 %v213_v12, %v212_v11  ;;  %v317_v55 = vld [vmem:[#allocation6 + $0x798] sm:$0xff]  ;;  %v50_v56 = vld [vmem:[#allocation3 + $0x40] sm:$0xff]  ;;  %v52_v58 = vld [vmem:[#allocation3 + $0x50] sm:$0xff] }
  0x6b   :  { %2420 = vmatpush3.bf16.msra.mxu0 %v2419_v21  ;;  %861 = vmatmul.mubr.f32.vlgmr.msra.gmra.mrb[2].mxu1 %v48_v22  ;;  %v2471_v21 = vpack.c.bf16 %v245_v15, %v244_v13  ;;  %v2441_v22 = vpack.c.bf16 %v231_v17, %v230_v16  ;;  %v300_v63 = vld [vmem:[#allocation6 + $0x710] sm:$0xff]  ;;  %v301_v1 = vld [vmem:[#allocation6 + $0x718] sm:$0xff]  ;;  %v287_v3 = vld [vmem:[#allocation6 + $0x6a8] sm:$0xff] }
  0x6c   :  { %2452 = vmatpush3.bf16.msra.mxu1 %v2451_v23  ;;  %2422 = vmatprep.subr.bf16.mxu0 %v2421_v24  ;;  %v214_v23 = vld [vmem:[#allocation6 + $0x460] sm:$0xff]  ;;  %v215_v24 = vld [vmem:[#allocation6 + $0x468] sm:$0xff]  ;;  %v288_v16 = vld [vmem:[#allocation6 + $0x6b0] sm:$0xff] }
  0x6d   :  { %2454 = vmatprep.subr.bf16.mxu1 %v2453_v28  ;;  %930 = vmatprep.mubr.f32.mxu0 %v51_v34  ;;  %v232_v28 = vld [vmem:[#allocation6 + $0x4f0] sm:$0xff]  ;;  %v2443_v32 = vpack.c.bf16 %v215_v24, %v214_v23  ;;  %v318_v4 = vld [vmem:[#allocation6 + $0x7a0] sm:$0xff]  ;;  %v319_v5 = vld [vmem:[#allocation6 + $0x7a8] sm:$0xff] }
  0x6e   :  { %1000 = vmatprep.mubr.f32.mxu1 %v53_v36  ;;  %v2445_v34 = vpack.c.bf16 %v233_v29, %v232_v28  ;;  %v217_v36 = vld [vmem:[#allocation6 + $0x478] sm:$0xff]  ;;  %v55_v6 = vld [vmem:[#allocation3 + $0x68] sm:$0xff]  ;;  %v270_v11 = vld [vmem:[#allocation6 + $0x620] sm:$0xff] }
  0x6f   :  { %2424 = vmatpush3.bf16.msra.mxu0 %v2423_v35  ;;  %v216_v35 = vld [vmem:[#allocation6 + $0x470] sm:$0xff]  ;;  %v271_v12 = vld [vmem:[#allocation6 + $0x628] sm:$0xff]  ;;  %v302_v13 = vld [vmem:[#allocation6 + $0x720] sm:$0xff] }
  0x70   :  { %2456 = vmatpush3.bf16.msra.mxu1 %v2455_v37  ;;  %2426 = vmatprep.subr.bf16.mxu0 %v2425_v38  ;;  %v248_v37 = vld [vmem:[#allocation6 + $0x570] sm:$0xff]  ;;  %v2477_v38 = vpack.c.bf16 %v265_v31, %v264_v30  ;;  %v2447_v44 = vpack.c.bf16 %v217_v36, %v216_v35  ;;  %v303_v15 = vld [vmem:[#allocation6 + $0x728] sm:$0xff]  ;;  %v289_v17 = vld [vmem:[#allocation6 + $0x6b8] sm:$0xff] }
  0x71   :  { %2458 = vmatprep.subr.bf16.mxu1 %v2457_v42  ;;  %v314_v42 = vld [vmem:[#allocation6 + $0x780] sm:$0xff]  ;;  %v2479_v45 = vpack.c.bf16 %v249_v39, %v248_v37  ;;  %v320_v18 = vld [vmem:[#allocation6 + $0x7b0] sm:$0xff]  ;;  %v321_v19 = vld [vmem:[#allocation6 + $0x7b8] sm:$0xff] }
  0x72   :  { %v272_v23 = vld [vmem:[#allocation6 + $0x630] sm:$0xff]  ;;  %v273_v24 = vld [vmem:[#allocation6 + $0x638] sm:$0xff]  ;;  %v290_v28 = vld [vmem:[#allocation6 + $0x6c0] sm:$0xff] }
  0x73   :  { %2428 = vmatpush3.bf16.msra.mxu0 %v2427_v48  ;;  %v267_v48 = vld [vmem:[#allocation6 + $0x608] sm:$0xff]  ;;  %v304_v25 = vld [vmem:[#allocation6 + $0x730] sm:$0xff]  ;;  %v305_v27 = vld [vmem:[#allocation6 + $0x738] sm:$0xff] }
  0x74   :  { %2460 = vmatpush3.bf16.msra.mxu1 %v2459_v49  ;;  %2430 = vmatprep.subr.bf16.mxu0 %v2429_v50  ;;  %v298_v49 = vld [vmem:[#allocation6 + $0x700] sm:$0xff]  ;;  %v2513_v50 = vpack.c.bf16 %v315_v43, %v314_v42  ;;  %v2483_v57 = vpack.c.bf16 %v267_v48, %v266_v47  ;;  %v291_v29 = vld [vmem:[#allocation6 + $0x6c8] sm:$0xff]  ;;  %v292_v40 = vld [vmem:[#allocation6 + $0x6d0] sm:$0xff] }
  0x75   :  { %2462 = vmatprep.subr.bf16.mxu1 %v2461_v54  ;;  %v316_v54 = vld [vmem:[#allocation6 + $0x790] sm:$0xff]  ;;  %v2515_v59 = vpack.c.bf16 %v299_v51, %v298_v49  ;;  %v322_v30 = vld [vmem:[#allocation6 + $0x7c0] sm:$0xff]  ;;  %v323_v31 = vld [vmem:[#allocation6 + $0x7c8] sm:$0xff] }
  0x76   :  { %v2517_v0 = vpack.c.bf16 %v317_v55, %v316_v54  ;;  %v274_v35 = vld [vmem:[#allocation6 + $0x640] sm:$0xff]  ;;  %v275_v36 = vld [vmem:[#allocation6 + $0x648] sm:$0xff]  ;;  %v293_v41 = vld [vmem:[#allocation6 + $0x6d8] sm:$0xff] }
  0x77   :  { %2432 = vmatpush3.bf16.msra.mxu0 %v2431_v60  ;;  %v2485_v60 = vpack.c.bf16 %v285_v53, %v284_v52  ;;  %v306_v37 = vld [vmem:[#allocation6 + $0x740] sm:$0xff]  ;;  %v307_v39 = vld [vmem:[#allocation6 + $0x748] sm:$0xff]  ;;  %v324_v42 = vld [vmem:[#allocation6 + $0x7d0] sm:$0xff] }
  0x78   :  { %2464 = vmatpush3.bf16.msra.mxu1 %v2463_v61  ;;  %2434 = vmatprep.subr.bf16.mxu0 %v2433_v62  ;;  %v268_v61 = vld [vmem:[#allocation6 + $0x610] sm:$0xff]  ;;  %v269_v62 = vld [vmem:[#allocation6 + $0x618] sm:$0xff]  ;;  %v294_v52 = vld [vmem:[#allocation6 + $0x6e0] sm:$0xff] }
  0x79   :  { %2466 = vmatprep.subr.bf16.mxu1 %v2465_v2  ;;  %v286_v2 = vld [vmem:[#allocation6 + $0x6a0] sm:$0xff]  ;;  %v2487_v7 = vpack.c.bf16 %v269_v62, %v268_v61  ;;  %v325_v43 = vld [vmem:[#allocation6 + $0x7d8] sm:$0xff]  ;;  %v276_v47 = vld [vmem:[#allocation6 + $0x650] sm:$0xff] }
  0x7a   :  { %v277_v48 = vld [vmem:[#allocation6 + $0x658] sm:$0xff]  ;;  %v308_v49 = vld [vmem:[#allocation6 + $0x750] sm:$0xff]  ;;  %v295_v53 = vld [vmem:[#allocation6 + $0x6e8] sm:$0xff] }
  0x7b   :  { %2436 = vmatpush3.bf16.msra.mxu0 %v2435_v8  ;;  %v57_v8 = vld [vmem:[#allocation3 + $0x78] sm:$0xff]  ;;  %v326_v54 = vld [vmem:[#allocation6 + $0x7e0] sm:$0xff]  ;;  %v327_v55 = vld [vmem:[#allocation6 + $0x7e8] sm:$0xff] }
  0x7c   :  { %2468 = vmatpush3.bf16.msra.mxu1 %v2467_v9  ;;  %2438 = vmatprep.subr.bf16.mxu0 %v2437_v10  ;;  %v2519_v9 = vpack.c.bf16 %v301_v1, %v300_v63  ;;  %v2489_v10 = vpack.c.bf16 %v287_v3, %v286_v2  ;;  %v309_v51 = vld [vmem:[#allocation6 + $0x758] sm:$0xff]  ;;  %v310_v61 = vld [vmem:[#allocation6 + $0x760] sm:$0xff]  ;;  %v2537_v62 = vpack.c.bf16 %v327_v55, %v326_v54  ;;  %v311_v63 = vld [vmem:[#allocation6 + $0x768] sm:$0xff] }
  0x7d   :  { %2470 = vmatprep.subr.bf16.mxu1 %v2469_v14  ;;  %v2521_v14 = vpack.c.bf16 %v319_v5, %v318_v4  ;;  %v297_v1 = vld [vmem:[#allocation6 + $0x6f8] sm:$0xff]  ;;  %v328_v2 = vld [vmem:[#allocation6 + $0x7f0] sm:$0xff]  ;;  %v2539_v5 = vpack.c.bf16 %v311_v63, %v310_v61 }
  0x7e   :  { %v329_v3 = vld [vmem:[#allocation6 + $0x7f8] sm:$0xff]  ;;  %v384_v54 = vld [vmem:[#allocation6 + $0x9b0] sm:$0xff] }
  0x7f   :  { %2440 = vmatpush3.bf16.msra.mxu0 %v2439_v20  ;;  %v2491_v20 = vpack.c.bf16 %v271_v12, %v270_v11  ;;  %v313_v11 = vld [vmem:[#allocation6 + $0x778] sm:$0xff]  ;;  %v346_v12 = vld [vmem:[#allocation6 + $0x880] sm:$0xff]  ;;  %v368_v61 = vld [vmem:[#allocation6 + $0x930] sm:$0xff] }
  0x80   :  { %2472 = vmatpush3.bf16.msra.mxu1 %v2471_v21  ;;  %2442 = vmatprep.subr.bf16.mxu0 %v2441_v22  ;;  %v2523_v21 = vpack.c.bf16 %v303_v15, %v302_v13  ;;  %v2493_v22 = vpack.c.bf16 %v289_v17, %v288_v16  ;;  %v347_v13 = vld [vmem:[#allocation6 + $0x888] sm:$0xff]  ;;  %v385_v55 = vld [vmem:[#allocation6 + $0x9b8] sm:$0xff] }
  0x81   :  { %2474 = vmatprep.subr.bf16.mxu1 %v2473_v26  ;;  %v2525_v26 = vpack.c.bf16 %v321_v19, %v320_v18  ;;  %v379_v15 = vld [vmem:[#allocation6 + $0x988] sm:$0xff]  ;;  %v2545_v18 = vpack.c.bf16 %v347_v13, %v346_v12  ;;  %v330_v19 = vld [vmem:[#allocation6 + $0x800] sm:$0xff]  ;;  %v369_v63 = vld [vmem:[#allocation6 + $0x938] sm:$0xff] }
  0x82   :  { %v356_v12 = vld [vmem:[#allocation6 + $0x8d0] sm:$0xff]  ;;  %v357_v13 = vld [vmem:[#allocation6 + $0x8d8] sm:$0xff] }
  0x83   :  { %2444 = vmatpush3.bf16.msra.mxu0 %v2443_v32  ;;  %v2495_v32 = vpack.c.bf16 %v273_v24, %v272_v23  ;;  %v363_v23 = vld [vmem:[#allocation6 + $0x908] sm:$0xff]  ;;  %v348_v24 = vld [vmem:[#allocation6 + $0x890] sm:$0xff] }
  0x84   :  { %2476 = vmatpush3.bf16.msra.mxu1 %v2475_v33  ;;  %2446 = vmatprep.subr.bf16.mxu0 %v2445_v34  ;;  %v2527_v33 = vpack.c.bf16 %v305_v27, %v304_v25  ;;  %v2497_v34 = vpack.c.bf16 %v291_v29, %v290_v28  ;;  %v349_v25 = vld [vmem:[#allocation6 + $0x898] sm:$0xff]  ;;  %v54_v28 = vld [vmem:[#allocation3 + $0x60] sm:$0xff] }
  0x85   :  { %2478 = vmatprep.subr.bf16.mxu1 %v2477_v38  ;;  %v2529_v38 = vpack.c.bf16 %v323_v31, %v322_v30  ;;  %v381_v27 = vld [vmem:[#allocation6 + $0x998] sm:$0xff]  ;;  %v56_v30 = vld [vmem:[#allocation3 + $0x70] sm:$0xff] }
  0x87   :  { %2448 = vmatpush3.bf16.msra.mxu0 %v2447_v44  ;;  %v2499_v44 = vpack.c.bf16 %v275_v36, %v274_v35  ;;  %v364_v35 = vld [vmem:[#allocation6 + $0x910] sm:$0xff] }
  0x88   :  { %2480 = vmatpush3.bf16.msra.mxu1 %v2479_v45  ;;  %2482 = vmatprep.subr.bf16.mxu0 %v2481_v46  ;;  %v2531_v45 = vpack.c.bf16 %v307_v39, %v306_v37  ;;  %v2501_v46 = vpack.c.bf16 %v293_v41, %v292_v40  ;;  %v365_v37 = vld [vmem:[#allocation6 + $0x918] sm:$0xff]  ;;  %v351_v39 = vld [vmem:[#allocation6 + $0x8a8] sm:$0xff]  ;;  %v382_v40 = vld [vmem:[#allocation6 + $0x9a0] sm:$0xff] }
  0x89   :  { %2514 = vmatprep.subr.bf16.mxu1 %v2513_v50  ;;  %v2533_v50 = vpack.c.bf16 %v325_v43, %v324_v42  ;;  %v383_v41 = vld [vmem:[#allocation6 + $0x9a8] sm:$0xff] }
  0x8a   :  { %931 = vmatmul.mubr.f32.vlgmr.msra.gmra.mrb[4].mxu0 %v50_v56  ;;  %v2503_v56 = vpack.c.bf16 %v277_v48, %v276_v47  ;;  %v59_v42 = vld [vmem:[#allocation3 + $0x88] sm:$0xff]  ;;  %v334_v47 = vld [vmem:[#allocation6 + $0x820] sm:$0xff] }
  0x8b   :  { %2484 = vmatpush3.bf16.msra.mxu0 %v2483_v57  ;;  %1001 = vmatmul.mubr.f32.vlgmr.msra.gmra.mrb[4].mxu1 %v52_v58  ;;  %v2535_v57 = vpack.c.bf16 %v309_v51, %v308_v49  ;;  %v2505_v58 = vpack.c.bf16 %v295_v53, %v294_v52  ;;  %v335_v48 = vld [vmem:[#allocation6 + $0x828] sm:$0xff]  ;;  %v366_v49 = vld [vmem:[#allocation6 + $0x920] sm:$0xff]  ;;  %v352_v52 = vld [vmem:[#allocation6 + $0x8b0] sm:$0xff] }
  0x8c   :  { %2516 = vmatpush3.bf16.msra.mxu1 %v2515_v59  ;;  %2486 = vmatprep.subr.bf16.mxu0 %v2485_v60  ;;  %v278_v59 = vld [vmem:[#allocation6 + $0x660] sm:$0xff]  ;;  %v279_v60 = vld [vmem:[#allocation6 + $0x668] sm:$0xff]  ;;  %v353_v53 = vld [vmem:[#allocation6 + $0x8b8] sm:$0xff] }
  0x8d   :  { %2518 = vmatprep.subr.bf16.mxu1 %v2517_v0  ;;  %1070 = vmatprep.mubr.f32.mxu0 %v55_v6  ;;  %v296_v0 = vld [vmem:[#allocation6 + $0x6f0] sm:$0xff]  ;;  %v2507_v4 = vpack.c.bf16 %v279_v60, %v278_v59  ;;  %v367_v51 = vld [vmem:[#allocation6 + $0x928] sm:$0xff]  ;;  %v337_v60 = vld [vmem:[#allocation6 + $0x838] sm:$0xff] }
  0x8e   :  { %1140 = vmatprep.mubr.f32.mxu1 %v57_v8  ;;  %v2509_v6 = vpack.c.bf16 %v297_v1, %v296_v0  ;;  %v281_v8 = vld [vmem:[#allocation6 + $0x678] sm:$0xff]  ;;  %v336_v59 = vld [vmem:[#allocation6 + $0x830] sm:$0xff]  ;;  %v354_v0 = vld [vmem:[#allocation6 + $0x8c0] sm:$0xff] }
  0x8f   :  { %2488 = vmatpush3.bf16.msra.mxu0 %v2487_v7  ;;  %v280_v7 = vld [vmem:[#allocation6 + $0x670] sm:$0xff]  ;;  %v355_v1 = vld [vmem:[#allocation6 + $0x8c8] sm:$0xff] }
  0x90   :  { %2520 = vmatpush3.bf16.msra.mxu1 %v2519_v9  ;;  %2490 = vmatprep.subr.bf16.mxu0 %v2489_v10  ;;  %v312_v9 = vld [vmem:[#allocation6 + $0x770] sm:$0xff]  ;;  %v2541_v10 = vpack.c.bf16 %v329_v3, %v328_v2  ;;  %v2511_v16 = vpack.c.bf16 %v281_v8, %v280_v7  ;;  %v386_v2 = vld [vmem:[#allocation6 + $0x9c0] sm:$0xff]  ;;  %v387_v3 = vld [vmem:[#allocation6 + $0x9c8] sm:$0xff] }
  0x91   :  { %2522 = vmatprep.subr.bf16.mxu1 %v2521_v14  ;;  %v378_v14 = vld [vmem:[#allocation6 + $0x980] sm:$0xff]  ;;  %v2543_v17 = vpack.c.bf16 %v313_v11, %v312_v9  ;;  %v339_v8 = vld [vmem:[#allocation6 + $0x848] sm:$0xff] }
  0x92   :  { %v338_v7 = vld [vmem:[#allocation6 + $0x840] sm:$0xff]  ;;  %v371_v11 = vld [vmem:[#allocation6 + $0x948] sm:$0xff] }
  0x93   :  { %2492 = vmatpush3.bf16.msra.mxu0 %v2491_v20  ;;  %v331_v20 = vld [vmem:[#allocation6 + $0x808] sm:$0xff]  ;;  %v370_v9 = vld [vmem:[#allocation6 + $0x940] sm:$0xff] }
  0x94   :  { %2524 = vmatpush3.bf16.msra.mxu1 %v2523_v21  ;;  %2494 = vmatprep.subr.bf16.mxu0 %v2493_v22  ;;  %v362_v21 = vld [vmem:[#allocation6 + $0x900] sm:$0xff]  ;;  %v2577_v22 = vpack.c.bf16 %v379_v15, %v378_v14  ;;  %v2547_v29 = vpack.c.bf16 %v331_v20, %v330_v19  ;;  %v388_v14 = vld [vmem:[#allocation6 + $0x9d0] sm:$0xff]  ;;  %v389_v15 = vld [vmem:[#allocation6 + $0x9d8] sm:$0xff] }
  0x95   :  { %2526 = vmatprep.subr.bf16.mxu1 %v2525_v26  ;;  %v380_v26 = vld [vmem:[#allocation6 + $0x990] sm:$0xff]  ;;  %v2579_v31 = vpack.c.bf16 %v363_v23, %v362_v21  ;;  %v341_v20 = vld [vmem:[#allocation6 + $0x858] sm:$0xff] }
  0x96   :  { %v2581_v36 = vpack.c.bf16 %v381_v27, %v380_v26  ;;  %v340_v19 = vld [vmem:[#allocation6 + $0x850] sm:$0xff]  ;;  %v373_v23 = vld [vmem:[#allocation6 + $0x958] sm:$0xff]  ;;  %v390_v26 = vld [vmem:[#allocation6 + $0x9e0] sm:$0xff] }
  0x97   :  { %2496 = vmatpush3.bf16.msra.mxu0 %v2495_v32  ;;  %v2549_v32 = vpack.c.bf16 %v349_v25, %v348_v24  ;;  %v372_v21 = vld [vmem:[#allocation6 + $0x950] sm:$0xff]  ;;  %v358_v24 = vld [vmem:[#allocation6 + $0x8e0] sm:$0xff]  ;;  %v359_v25 = vld [vmem:[#allocation6 + $0x8e8] sm:$0xff] }
  0x98   :  { %2528 = vmatpush3.bf16.msra.mxu1 %v2527_v33  ;;  %2498 = vmatprep.subr.bf16.mxu0 %v2497_v34  ;;  %v332_v33 = vld [vmem:[#allocation6 + $0x810] sm:$0xff]  ;;  %v333_v34 = vld [vmem:[#allocation6 + $0x818] sm:$0xff]  ;;  %v391_v27 = vld [vmem:[#allocation6 + $0x9e8] sm:$0xff] }
  0x99   :  { %2530 = vmatprep.subr.bf16.mxu1 %v2529_v38  ;;  %v350_v38 = vld [vmem:[#allocation6 + $0x8a0] sm:$0xff]  ;;  %v2551_v43 = vpack.c.bf16 %v333_v34, %v332_v33  ;;  %v2601_v34 = vpack.c.bf16 %v391_v27, %v390_v26  ;;  %v448_v26 = vld [vmem:[#allocation6 + $0xbb0] sm:$0xff]  ;;  %v449_v27 = vld [vmem:[#allocation6 + $0xbb8] sm:$0xff] }
  0x9a   :  { %v374_v33 = vld [vmem:[#allocation6 + $0x960] sm:$0xff] }
  0x9b   :  { %2500 = vmatpush3.bf16.msra.mxu0 %v2499_v44  ;;  %v61_v44 = vld [vmem:[#allocation3 + $0x98] sm:$0xff] }
  0x9c   :  { %2532 = vmatpush3.bf16.msra.mxu1 %v2531_v45  ;;  %2502 = vmatprep.subr.bf16.mxu0 %v2501_v46  ;;  %v2583_v45 = vpack.c.bf16 %v365_v37, %v364_v35  ;;  %v2553_v46 = vpack.c.bf16 %v351_v39, %v350_v38  ;;  %v375_v35 = vld [vmem:[#allocation6 + $0x968] sm:$0xff]  ;;  %v361_v37 = vld [vmem:[#allocation6 + $0x8f8] sm:$0xff]  ;;  %v392_v38 = vld [vmem:[#allocation6 + $0x9f0] sm:$0xff] }
  0x9d   :  { %2534 = vmatprep.subr.bf16.mxu1 %v2533_v50  ;;  %v2585_v50 = vpack.c.bf16 %v383_v41, %v382_v40  ;;  %v393_v39 = vld [vmem:[#allocation6 + $0x9f8] sm:$0xff]  ;;  %v2603_v41 = vpack.c.bf16 %v375_v35, %v374_v33  ;;  %v432_v33 = vld [vmem:[#allocation6 + $0xb30] sm:$0xff] }
  0x9e   :  { %v433_v35 = vld [vmem:[#allocation6 + $0xb38] sm:$0xff] }
  0x9f   :  { %2504 = vmatpush3.bf16.msra.mxu0 %v2503_v56  ;;  %v2555_v56 = vpack.c.bf16 %v335_v48, %v334_v47  ;;  %v377_v47 = vld [vmem:[#allocation6 + $0x978] sm:$0xff]  ;;  %v410_v48 = vld [vmem:[#allocation6 + $0xa80] sm:$0xff] }
  0xa0   :  { %2536 = vmatpush3.bf16.msra.mxu1 %v2535_v57  ;;  %2506 = vmatprep.subr.bf16.mxu0 %v2505_v58  ;;  %v2587_v57 = vpack.c.bf16 %v367_v51, %v366_v49  ;;  %v2557_v58 = vpack.c.bf16 %v353_v53, %v352_v52  ;;  %v411_v49 = vld [vmem:[#allocation6 + $0xa88] sm:$0xff] }
  0xa1   :  { %2538 = vmatprep.subr.bf16.mxu1 %v2537_v62  ;;  %v2589_v62 = vpack.c.bf16 %v385_v55, %v384_v54  ;;  %v443_v51 = vld [vmem:[#allocation6 + $0xb88] sm:$0xff]  ;;  %v2609_v54 = vpack.c.bf16 %v411_v49, %v410_v48  ;;  %v394_v55 = vld [vmem:[#allocation6 + $0xa00] sm:$0xff]  ;;  %v420_v48 = vld [vmem:[#allocation6 + $0xad0] sm:$0xff] }
  0xa2   :  { %v421_v49 = vld [vmem:[#allocation6 + $0xad8] sm:$0xff] }
  0xa3   :  { %2508 = vmatpush3.bf16.msra.mxu0 %v2507_v4  ;;  %v2559_v4 = vpack.c.bf16 %v337_v60, %v336_v59  ;;  %v427_v59 = vld [vmem:[#allocation6 + $0xb08] sm:$0xff]  ;;  %v412_v60 = vld [vmem:[#allocation6 + $0xa90] sm:$0xff] }
  0xa4   :  { %2540 = vmatpush3.bf16.msra.mxu1 %v2539_v5  ;;  %2510 = vmatprep.subr.bf16.mxu0 %v2509_v6  ;;  %v2591_v5 = vpack.c.bf16 %v369_v63, %v368_v61  ;;  %v2561_v6 = vpack.c.bf16 %v355_v1, %v354_v0  ;;  %v413_v61 = vld [vmem:[#allocation6 + $0xa98] sm:$0xff]  ;;  %v58_v0 = vld [vmem:[#allocation3 + $0x80] sm:$0xff] }
  0xa5   :  { %2542 = vmatprep.subr.bf16.mxu1 %v2541_v10  ;;  %v2593_v10 = vpack.c.bf16 %v387_v3, %v386_v2  ;;  %v445_v63 = vld [vmem:[#allocation6 + $0xb98] sm:$0xff]  ;;  %v60_v2 = vld [vmem:[#allocation3 + $0x90] sm:$0xff] }
  0xa7   :  { %2512 = vmatpush3.bf16.msra.mxu0 %v2511_v16  ;;  %v2563_v16 = vpack.c.bf16 %v339_v8, %v338_v7  ;;  %v428_v7 = vld [vmem:[#allocation6 + $0xb10] sm:$0xff] }
  0xa8   :  { %2544 = vmatpush3.bf16.msra.mxu1 %v2543_v17  ;;  %2546 = vmatprep.subr.bf16.mxu0 %v2545_v18  ;;  %v2595_v17 = vpack.c.bf16 %v371_v11, %v370_v9  ;;  %v2565_v18 = vpack.c.bf16 %v357_v13, %v356_v12  ;;  %v429_v9 = vld [vmem:[#allocation6 + $0xb18] sm:$0xff]  ;;  %v415_v11 = vld [vmem:[#allocation6 + $0xaa8] sm:$0xff]  ;;  %v446_v12 = vld [vmem:[#allocation6 + $0xba0] sm:$0xff] }
  0xa9   :  { %2578 = vmatprep.subr.bf16.mxu1 %v2577_v22  ;;  %v2597_v22 = vpack.c.bf16 %v389_v15, %v388_v14  ;;  %v447_v13 = vld [vmem:[#allocation6 + $0xba8] sm:$0xff] }
  0xaa   :  { %1071 = vmatmul.mubr.f32.vlgmr.msra.gmra.mrb[6].mxu0 %v54_v28  ;;  %v2567_v28 = vpack.c.bf16 %v341_v20, %v340_v19  ;;  %v63_v14 = vld [vmem:[#allocation3 + $0xa8] sm:$0xff]  ;;  %v398_v19 = vld [vmem:[#allocation6 + $0xa20] sm:$0xff] }
  0xab   :  { %2548 = vmatpush3.bf16.msra.mxu0 %v2547_v29  ;;  %1141 = vmatmul.mubr.f32.vlgmr.msra.gmra.mrb[6].mxu1 %v56_v30  ;;  %v2599_v29 = vpack.c.bf16 %v373_v23, %v372_v21  ;;  %v2569_v30 = vpack.c.bf16 %v359_v25, %v358_v24  ;;  %v399_v20 = vld [vmem:[#allocation6 + $0xa28] sm:$0xff]  ;;  %v430_v21 = vld [vmem:[#allocation6 + $0xb20] sm:$0xff]  ;;  %v416_v24 = vld [vmem:[#allocation6 + $0xab0] sm:$0xff] }
  0xac   :  { %2580 = vmatpush3.bf16.msra.mxu1 %v2579_v31  ;;  %2550 = vmatprep.subr.bf16.mxu0 %v2549_v32  ;;  %v342_v31 = vld [vmem:[#allocation6 + $0x860] sm:$0xff]  ;;  %v343_v32 = vld [vmem:[#allocation6 + $0x868] sm:$0xff]  ;;  %v417_v25 = vld [vmem:[#allocation6 + $0xab8] sm:$0xff] }
  0xad   :  { %2582 = vmatprep.subr.bf16.mxu1 %v2581_v36  ;;  %1210 = vmatprep.mubr.f32.mxu0 %v59_v42  ;;  %v360_v36 = vld [vmem:[#allocation6 + $0x8f0] sm:$0xff]  ;;  %v2571_v40 = vpack.c.bf16 %v343_v32, %v342_v31  ;;  %v431_v23 = vld [vmem:[#allocation6 + $0xb28] sm:$0xff]  ;;  %v401_v32 = vld [vmem:[#allocation6 + $0xa38] sm:$0xff] }
  0xae   :  { %1280 = vmatprep.mubr.f32.mxu1 %v61_v44  ;;  %v2573_v42 = vpack.c.bf16 %v361_v37, %v360_v36  ;;  %v345_v44 = vld [vmem:[#allocation6 + $0x878] sm:$0xff]  ;;  %v400_v31 = vld [vmem:[#allocation6 + $0xa30] sm:$0xff]  ;;  %v418_v36 = vld [vmem:[#allocation6 + $0xac0] sm:$0xff] }
  0xaf   :  { %2552 = vmatpush3.bf16.msra.mxu0 %v2551_v43  ;;  %v344_v43 = vld [vmem:[#allocation6 + $0x870] sm:$0xff]  ;;  %v419_v37 = vld [vmem:[#allocation6 + $0xac8] sm:$0xff] }
  0xb0   :  { %2584 = vmatpush3.bf16.msra.mxu1 %v2583_v45  ;;  %2554 = vmatprep.subr.bf16.mxu0 %v2553_v46  ;;  %v376_v45 = vld [vmem:[#allocation6 + $0x970] sm:$0xff]  ;;  %v2605_v46 = vpack.c.bf16 %v393_v39, %v392_v38  ;;  %v2575_v52 = vpack.c.bf16 %v345_v44, %v344_v43  ;;  %v450_v38 = vld [vmem:[#allocation6 + $0xbc0] sm:$0xff]  ;;  %v451_v39 = vld [vmem:[#allocation6 + $0xbc8] sm:$0xff] }
  0xb1   :  { %2586 = vmatprep.subr.bf16.mxu1 %v2585_v50  ;;  %v442_v50 = vld [vmem:[#allocation6 + $0xb80] sm:$0xff]  ;;  %v2607_v53 = vpack.c.bf16 %v377_v47, %v376_v45  ;;  %v403_v44 = vld [vmem:[#allocation6 + $0xa48] sm:$0xff] }
  0xb2   :  { %v402_v43 = vld [vmem:[#allocation6 + $0xa40] sm:$0xff]  ;;  %v435_v47 = vld [vmem:[#allocation6 + $0xb48] sm:$0xff] }
  0xb3   :  { %2556 = vmatpush3.bf16.msra.mxu0 %v2555_v56  ;;  %v395_v56 = vld [vmem:[#allocation6 + $0xa08] sm:$0xff]  ;;  %v434_v45 = vld [vmem:[#allocation6 + $0xb40] sm:$0xff] }
  0xb4   :  { %2588 = vmatpush3.bf16.msra.mxu1 %v2587_v57  ;;  %2558 = vmatprep.subr.bf16.mxu0 %v2557_v58  ;;  %v426_v57 = vld [vmem:[#allocation6 + $0xb00] sm:$0xff]  ;;  %v2641_v58 = vpack.c.bf16 %v443_v51, %v442_v50  ;;  %v2611_v1 = vpack.c.bf16 %v395_v56, %v394_v55  ;;  %v452_v50 = vld [vmem:[#allocation6 + $0xbd0] sm:$0xff]  ;;  %v453_v51 = vld [vmem:[#allocation6 + $0xbd8] sm:$0xff] }
  0xb5   :  { %2590 = vmatprep.subr.bf16.mxu1 %v2589_v62  ;;  %v444_v62 = vld [vmem:[#allocation6 + $0xb90] sm:$0xff]  ;;  %v2643_v3 = vpack.c.bf16 %v427_v59, %v426_v57  ;;  %v405_v56 = vld [vmem:[#allocation6 + $0xa58] sm:$0xff] }
  0xb6   :  { %v2645_v8 = vpack.c.bf16 %v445_v63, %v444_v62  ;;  %v404_v55 = vld [vmem:[#allocation6 + $0xa50] sm:$0xff]  ;;  %v437_v59 = vld [vmem:[#allocation6 + $0xb58] sm:$0xff]  ;;  %v454_v62 = vld [vmem:[#allocation6 + $0xbe0] sm:$0xff] }
  0xb7   :  { %2560 = vmatpush3.bf16.msra.mxu0 %v2559_v4  ;;  %v2613_v4 = vpack.c.bf16 %v413_v61, %v412_v60  ;;  %v436_v57 = vld [vmem:[#allocation6 + $0xb50] sm:$0xff]  ;;  %v422_v60 = vld [vmem:[#allocation6 + $0xae0] sm:$0xff]  ;;  %v423_v61 = vld [vmem:[#allocation6 + $0xae8] sm:$0xff] }
  0xb8   :  { %2592 = vmatpush3.bf16.msra.mxu1 %v2591_v5  ;;  %2562 = vmatprep.subr.bf16.mxu0 %v2561_v6  ;;  %v396_v5 = vld [vmem:[#allocation6 + $0xa10] sm:$0xff]  ;;  %v397_v6 = vld [vmem:[#allocation6 + $0xa18] sm:$0xff]  ;;  %v455_v63 = vld [vmem:[#allocation6 + $0xbe8] sm:$0xff] }
  0xb9   :  { %2594 = vmatprep.subr.bf16.mxu1 %v2593_v10  ;;  %v414_v10 = vld [vmem:[#allocation6 + $0xaa0] sm:$0xff]  ;;  %v2615_v15 = vpack.c.bf16 %v397_v6, %v396_v5  ;;  %v2665_v6 = vpack.c.bf16 %v455_v63, %v454_v62  ;;  %v512_v62 = vld [vmem:[#allocation6 + $0xdb0] sm:$0xff]  ;;  %v513_v63 = vld [vmem:[#allocation6 + $0xdb8] sm:$0xff] }
  0xba   :  { %v438_v5 = vld [vmem:[#allocation6 + $0xb60] sm:$0xff] }
  0xbb   :  { %2564 = vmatpush3.bf16.msra.mxu0 %v2563_v16  ;;  %v65_v16 = vld [vmem:[#allocation3 + $0xb8] sm:$0xff] }
  0xbc   :  { %2596 = vmatpush3.bf16.msra.mxu1 %v2595_v17  ;;  %2566 = vmatprep.subr.bf16.mxu0 %v2565_v18  ;;  %v2647_v17 = vpack.c.bf16 %v429_v9, %v428_v7  ;;  %v2617_v18 = vpack.c.bf16 %v415_v11, %v414_v10  ;;  %v439_v7 = vld [vmem:[#allocation6 + $0xb68] sm:$0xff]  ;;  %v425_v9 = vld [vmem:[#allocation6 + $0xaf8] sm:$0xff]  ;;  %v456_v10 = vld [vmem:[#allocation6 + $0xbf0] sm:$0xff] }
  0xbd   :  { %2598 = vmatprep.subr.bf16.mxu1 %v2597_v22  ;;  %v2649_v22 = vpack.c.bf16 %v447_v13, %v446_v12  ;;  %v457_v11 = vld [vmem:[#allocation6 + $0xbf8] sm:$0xff]  ;;  %v2667_v13 = vpack.c.bf16 %v439_v7, %v438_v5  ;;  %v496_v5 = vld [vmem:[#allocation6 + $0xd30] sm:$0xff] }
  0xbe   :  { %v497_v7 = vld [vmem:[#allocation6 + $0xd38] sm:$0xff] }
  0xbf   :  { %2568 = vmatpush3.bf16.msra.mxu0 %v2567_v28  ;;  %v2619_v28 = vpack.c.bf16 %v399_v20, %v398_v19  ;;  %v441_v19 = vld [vmem:[#allocation6 + $0xb78] sm:$0xff]  ;;  %v474_v20 = vld [vmem:[#allocation6 + $0xc80] sm:$0xff] }
  0xc0   :  { %2600 = vmatpush3.bf16.msra.mxu1 %v2599_v29  ;;  %2570 = vmatprep.subr.bf16.mxu0 %v2569_v30  ;;  %v2651_v29 = vpack.c.bf16 %v431_v23, %v430_v21  ;;  %v2621_v30 = vpack.c.bf16 %v417_v25, %v416_v24  ;;  %v475_v21 = vld [vmem:[#allocation6 + $0xc88] sm:$0xff] }
  0xc1   :  { %2602 = vmatprep.subr.bf16.mxu1 %v2601_v34  ;;  %v2653_v34 = vpack.c.bf16 %v449_v27, %v448_v26  ;;  %v507_v23 = vld [vmem:[#allocation6 + $0xd88] sm:$0xff]  ;;  %v2673_v26 = vpack.c.bf16 %v475_v21, %v474_v20  ;;  %v458_v27 = vld [vmem:[#allocation6 + $0xc00] sm:$0xff]  ;;  %v484_v20 = vld [vmem:[#allocation6 + $0xcd0] sm:$0xff] }
  0xc2   :  { %v485_v21 = vld [vmem:[#allocation6 + $0xcd8] sm:$0xff] }
  0xc3   :  { %2572 = vmatpush3.bf16.msra.mxu0 %v2571_v40  ;;  %v2623_v40 = vpack.c.bf16 %v401_v32, %v400_v31  ;;  %v491_v31 = vld [vmem:[#allocation6 + $0xd08] sm:$0xff]  ;;  %v476_v32 = vld [vmem:[#allocation6 + $0xc90] sm:$0xff] }
  0xc4   :  { %2604 = vmatpush3.bf16.msra.mxu1 %v2603_v41  ;;  %2574 = vmatprep.subr.bf16.mxu0 %v2573_v42  ;;  %v2655_v41 = vpack.c.bf16 %v433_v35, %v432_v33  ;;  %v2625_v42 = vpack.c.bf16 %v419_v37, %v418_v36  ;;  %v477_v33 = vld [vmem:[#allocation6 + $0xc98] sm:$0xff]  ;;  %v62_v36 = vld [vmem:[#allocation3 + $0xa0] sm:$0xff] }
  0xc5   :  { %2606 = vmatprep.subr.bf16.mxu1 %v2605_v46  ;;  %v2657_v46 = vpack.c.bf16 %v451_v39, %v450_v38  ;;  %v509_v35 = vld [vmem:[#allocation6 + $0xd98] sm:$0xff]  ;;  %v64_v38 = vld [vmem:[#allocation3 + $0xb0] sm:$0xff] }
  0xc7   :  { %2576 = vmatpush3.bf16.msra.mxu0 %v2575_v52  ;;  %v2627_v52 = vpack.c.bf16 %v403_v44, %v402_v43  ;;  %v492_v43 = vld [vmem:[#allocation6 + $0xd10] sm:$0xff] }
  0xc8   :  { %2608 = vmatpush3.bf16.msra.mxu1 %v2607_v53  ;;  %2610 = vmatprep.subr.bf16.mxu0 %v2609_v54  ;;  %v2659_v53 = vpack.c.bf16 %v435_v47, %v434_v45  ;;  %v2629_v54 = vpack.c.bf16 %v421_v49, %v420_v48  ;;  %v493_v45 = vld [vmem:[#allocation6 + $0xd18] sm:$0xff]  ;;  %v479_v47 = vld [vmem:[#allocation6 + $0xca8] sm:$0xff]  ;;  %v510_v48 = vld [vmem:[#allocation6 + $0xda0] sm:$0xff] }
  0xc9   :  { %2642 = vmatprep.subr.bf16.mxu1 %v2641_v58  ;;  %v2661_v58 = vpack.c.bf16 %v453_v51, %v452_v50  ;;  %v511_v49 = vld [vmem:[#allocation6 + $0xda8] sm:$0xff] }
  0xca   :  { %1211 = vmatmul.mubr.f32.vlgmr.msra.gmra.mrb[8].mxu0 %v58_v0  ;;  %v2631_v0 = vpack.c.bf16 %v405_v56, %v404_v55  ;;  %v67_v50 = vld [vmem:[#allocation3 + $0xc8] sm:$0xff]  ;;  %v462_v55 = vld [vmem:[#allocation6 + $0xc20] sm:$0xff] }
  0xcb   :  { %2612 = vmatpush3.bf16.msra.mxu0 %v2611_v1  ;;  %1281 = vmatmul.mubr.f32.vlgmr.msra.gmra.mrb[8].mxu1 %v60_v2  ;;  %v2663_v1 = vpack.c.bf16 %v437_v59, %v436_v57  ;;  %v2633_v2 = vpack.c.bf16 %v423_v61, %v422_v60  ;;  %v463_v56 = vld [vmem:[#allocation6 + $0xc28] sm:$0xff]  ;;  %v494_v57 = vld [vmem:[#allocation6 + $0xd20] sm:$0xff]  ;;  %v480_v60 = vld [vmem:[#allocation6 + $0xcb0] sm:$0xff] }
  0xcc   :  { %2644 = vmatpush3.bf16.msra.mxu1 %v2643_v3  ;;  %2614 = vmatprep.subr.bf16.mxu0 %v2613_v4  ;;  %v406_v3 = vld [vmem:[#allocation6 + $0xa60] sm:$0xff]  ;;  %v407_v4 = vld [vmem:[#allocation6 + $0xa68] sm:$0xff]  ;;  %v481_v61 = vld [vmem:[#allocation6 + $0xcb8] sm:$0xff] }
  0xcd   :  { %2646 = vmatprep.subr.bf16.mxu1 %v2645_v8  ;;  %1350 = vmatprep.mubr.f32.mxu0 %v63_v14  ;;  %v424_v8 = vld [vmem:[#allocation6 + $0xaf0] sm:$0xff]  ;;  %v2635_v12 = vpack.c.bf16 %v407_v4, %v406_v3  ;;  %v495_v59 = vld [vmem:[#allocation6 + $0xd28] sm:$0xff]  ;;  %v465_v4 = vld [vmem:[#allocation6 + $0xc38] sm:$0xff] }
  0xce   :  { %1420 = vmatprep.mubr.f32.mxu1 %v65_v16  ;;  %v2637_v14 = vpack.c.bf16 %v425_v9, %v424_v8  ;;  %v409_v16 = vld [vmem:[#allocation6 + $0xa78] sm:$0xff]  ;;  %v464_v3 = vld [vmem:[#allocation6 + $0xc30] sm:$0xff]  ;;  %v482_v8 = vld [vmem:[#allocation6 + $0xcc0] sm:$0xff] }
  0xcf   :  { %2616 = vmatpush3.bf16.msra.mxu0 %v2615_v15  ;;  %v408_v15 = vld [vmem:[#allocation6 + $0xa70] sm:$0xff]  ;;  %v483_v9 = vld [vmem:[#allocation6 + $0xcc8] sm:$0xff] }
  0xd0   :  { %2648 = vmatpush3.bf16.msra.mxu1 %v2647_v17  ;;  %2618 = vmatprep.subr.bf16.mxu0 %v2617_v18  ;;  %v440_v17 = vld [vmem:[#allocation6 + $0xb70] sm:$0xff]  ;;  %v2669_v18 = vpack.c.bf16 %v457_v11, %v456_v10  ;;  %v2639_v24 = vpack.c.bf16 %v409_v16, %v408_v15  ;;  %v514_v10 = vld [vmem:[#allocation6 + $0xdc0] sm:$0xff]  ;;  %v515_v11 = vld [vmem:[#allocation6 + $0xdc8] sm:$0xff] }
  0xd1   :  { %2650 = vmatprep.subr.bf16.mxu1 %v2649_v22  ;;  %v506_v22 = vld [vmem:[#allocation6 + $0xd80] sm:$0xff]  ;;  %v2671_v25 = vpack.c.bf16 %v441_v19, %v440_v17  ;;  %v467_v16 = vld [vmem:[#allocation6 + $0xc48] sm:$0xff] }
  0xd2   :  { %v466_v15 = vld [vmem:[#allocation6 + $0xc40] sm:$0xff]  ;;  %v499_v19 = vld [vmem:[#allocation6 + $0xd48] sm:$0xff] }
  0xd3   :  { %2620 = vmatpush3.bf16.msra.mxu0 %v2619_v28  ;;  %v459_v28 = vld [vmem:[#allocation6 + $0xc08] sm:$0xff]  ;;  %v498_v17 = vld [vmem:[#allocation6 + $0xd40] sm:$0xff] }
  0xd4   :  { %2652 = vmatpush3.bf16.msra.mxu1 %v2651_v29  ;;  %2622 = vmatprep.subr.bf16.mxu0 %v2621_v30  ;;  %v490_v29 = vld [vmem:[#allocation6 + $0xd00] sm:$0xff]  ;;  %v2705_v30 = vpack.c.bf16 %v507_v23, %v506_v22  ;;  %v2675_v37 = vpack.c.bf16 %v459_v28, %v458_v27  ;;  %v516_v22 = vld [vmem:[#allocation6 + $0xdd0] sm:$0xff]  ;;  %v517_v23 = vld [vmem:[#allocation6 + $0xdd8] sm:$0xff] }
  0xd5   :  { %2654 = vmatprep.subr.bf16.mxu1 %v2653_v34  ;;  %v508_v34 = vld [vmem:[#allocation6 + $0xd90] sm:$0xff]  ;;  %v2707_v39 = vpack.c.bf16 %v491_v31, %v490_v29  ;;  %v469_v28 = vld [vmem:[#allocation6 + $0xc58] sm:$0xff] }
  0xd6   :  { %v2709_v44 = vpack.c.bf16 %v509_v35, %v508_v34  ;;  %v468_v27 = vld [vmem:[#allocation6 + $0xc50] sm:$0xff]  ;;  %v501_v31 = vld [vmem:[#allocation6 + $0xd58] sm:$0xff]  ;;  %v518_v34 = vld [vmem:[#allocation6 + $0xde0] sm:$0xff] }
  0xd7   :  { %2624 = vmatpush3.bf16.msra.mxu0 %v2623_v40  ;;  %v2677_v40 = vpack.c.bf16 %v477_v33, %v476_v32  ;;  %v500_v29 = vld [vmem:[#allocation6 + $0xd50] sm:$0xff]  ;;  %v486_v32 = vld [vmem:[#allocation6 + $0xce0] sm:$0xff]  ;;  %v487_v33 = vld [vmem:[#allocation6 + $0xce8] sm:$0xff] }
  0xd8   :  { %2656 = vmatpush3.bf16.msra.mxu1 %v2655_v41  ;;  %2626 = vmatprep.subr.bf16.mxu0 %v2625_v42  ;;  %v460_v41 = vld [vmem:[#allocation6 + $0xc10] sm:$0xff]  ;;  %v461_v42 = vld [vmem:[#allocation6 + $0xc18] sm:$0xff]  ;;  %v519_v35 = vld [vmem:[#allocation6 + $0xde8] sm:$0xff] }
  0xd9   :  { %2658 = vmatprep.subr.bf16.mxu1 %v2657_v46  ;;  %v478_v46 = vld [vmem:[#allocation6 + $0xca0] sm:$0xff]  ;;  %v2679_v51 = vpack.c.bf16 %v461_v42, %v460_v41  ;;  %v2729_v42 = vpack.c.bf16 %v519_v35, %v518_v34  ;;  %v576_v34 = vld [vmem:[#allocation6 + $0xfb0] sm:$0xff]  ;;  %v577_v35 = vld [vmem:[#allocation6 + $0xfb8] sm:$0xff] }
  0xda   :  { %v502_v41 = vld [vmem:[#allocation6 + $0xd60] sm:$0xff] }
  0xdb   :  { %2628 = vmatpush3.bf16.msra.mxu0 %v2627_v52  ;;  %v69_v52 = vld [vmem:[#allocation3 + $0xd8] sm:$0xff] }
  0xdc   :  { %2660 = vmatpush3.bf16.msra.mxu1 %v2659_v53  ;;  %2630 = vmatprep.subr.bf16.mxu0 %v2629_v54  ;;  %v2711_v53 = vpack.c.bf16 %v493_v45, %v492_v43  ;;  %v2681_v54 = vpack.c.bf16 %v479_v47, %v478_v46  ;;  %v503_v43 = vld [vmem:[#allocation6 + $0xd68] sm:$0xff]  ;;  %v489_v45 = vld [vmem:[#allocation6 + $0xcf8] sm:$0xff]  ;;  %v520_v46 = vld [vmem:[#allocation6 + $0xdf0] sm:$0xff] }
  0xdd   :  { %2662 = vmatprep.subr.bf16.mxu1 %v2661_v58  ;;  %v2713_v58 = vpack.c.bf16 %v511_v49, %v510_v48  ;;  %v521_v47 = vld [vmem:[#allocation6 + $0xdf8] sm:$0xff]  ;;  %v2731_v49 = vpack.c.bf16 %v503_v43, %v502_v41  ;;  %v560_v41 = vld [vmem:[#allocation6 + $0xf30] sm:$0xff] }
  0xde   :  { %v561_v43 = vld [vmem:[#allocation6 + $0xf38] sm:$0xff] }
  0xdf   :  { %2632 = vmatpush3.bf16.msra.mxu0 %v2631_v0  ;;  %v2683_v0 = vpack.c.bf16 %v463_v56, %v462_v55  ;;  %v505_v55 = vld [vmem:[#allocation6 + $0xd78] sm:$0xff]  ;;  %v538_v56 = vld [vmem:[#allocation6 + $0xe80] sm:$0xff] }
  0xe0   :  { %2664 = vmatpush3.bf16.msra.mxu1 %v2663_v1  ;;  %2634 = vmatprep.subr.bf16.mxu0 %v2633_v2  ;;  %v2715_v1 = vpack.c.bf16 %v495_v59, %v494_v57  ;;  %v2685_v2 = vpack.c.bf16 %v481_v61, %v480_v60  ;;  %v539_v57 = vld [vmem:[#allocation6 + $0xe88] sm:$0xff] }
  0xe1   :  { %2666 = vmatprep.subr.bf16.mxu1 %v2665_v6  ;;  %v2717_v6 = vpack.c.bf16 %v513_v63, %v512_v62  ;;  %v571_v59 = vld [vmem:[#allocation6 + $0xf88] sm:$0xff]  ;;  %v2737_v62 = vpack.c.bf16 %v539_v57, %v538_v56  ;;  %v522_v63 = vld [vmem:[#allocation6 + $0xe00] sm:$0xff]  ;;  %v548_v56 = vld [vmem:[#allocation6 + $0xed0] sm:$0xff] }
  0xe2   :  { %v549_v57 = vld [vmem:[#allocation6 + $0xed8] sm:$0xff] }
  0xe3   :  { %2636 = vmatpush3.bf16.msra.mxu0 %v2635_v12  ;;  %v2687_v12 = vpack.c.bf16 %v465_v4, %v464_v3  ;;  %v555_v3 = vld [vmem:[#allocation6 + $0xf08] sm:$0xff]  ;;  %v540_v4 = vld [vmem:[#allocation6 + $0xe90] sm:$0xff] }
  0xe4   :  { %2668 = vmatpush3.bf16.msra.mxu1 %v2667_v13  ;;  %2638 = vmatprep.subr.bf16.mxu0 %v2637_v14  ;;  %v2719_v13 = vpack.c.bf16 %v497_v7, %v496_v5  ;;  %v2689_v14 = vpack.c.bf16 %v483_v9, %v482_v8  ;;  %v541_v5 = vld [vmem:[#allocation6 + $0xe98] sm:$0xff]  ;;  %v66_v8 = vld [vmem:[#allocation3 + $0xc0] sm:$0xff] }
  0xe5   :  { %2670 = vmatprep.subr.bf16.mxu1 %v2669_v18  ;;  %v2721_v18 = vpack.c.bf16 %v515_v11, %v514_v10  ;;  %v573_v7 = vld [vmem:[#allocation6 + $0xf98] sm:$0xff]  ;;  %v68_v10 = vld [vmem:[#allocation3 + $0xd0] sm:$0xff] }
  0xe7   :  { %2640 = vmatpush3.bf16.msra.mxu0 %v2639_v24  ;;  %v2691_v24 = vpack.c.bf16 %v467_v16, %v466_v15  ;;  %v556_v15 = vld [vmem:[#allocation6 + $0xf10] sm:$0xff] }
  0xe8   :  { %2672 = vmatpush3.bf16.msra.mxu1 %v2671_v25  ;;  %2674 = vmatprep.subr.bf16.mxu0 %v2673_v26  ;;  %v2723_v25 = vpack.c.bf16 %v499_v19, %v498_v17  ;;  %v2693_v26 = vpack.c.bf16 %v485_v21, %v484_v20  ;;  %v557_v17 = vld [vmem:[#allocation6 + $0xf18] sm:$0xff]  ;;  %v543_v19 = vld [vmem:[#allocation6 + $0xea8] sm:$0xff]  ;;  %v574_v20 = vld [vmem:[#allocation6 + $0xfa0] sm:$0xff] }
  0xe9   :  { %2706 = vmatprep.subr.bf16.mxu1 %v2705_v30  ;;  %v2725_v30 = vpack.c.bf16 %v517_v23, %v516_v22  ;;  %v575_v21 = vld [vmem:[#allocation6 + $0xfa8] sm:$0xff] }
  0xea   :  { %1351 = vmatmul.mubr.f32.vlgmr.msra.gmra.mrb[10].mxu0 %v62_v36  ;;  %v2695_v36 = vpack.c.bf16 %v469_v28, %v468_v27  ;;  %v71_v22 = vld [vmem:[#allocation3 + $0xe8] sm:$0xff]  ;;  %v526_v27 = vld [vmem:[#allocation6 + $0xe20] sm:$0xff] }
  0xeb   :  { %2676 = vmatpush3.bf16.msra.mxu0 %v2675_v37  ;;  %1421 = vmatmul.mubr.f32.vlgmr.msra.gmra.mrb[10].mxu1 %v64_v38  ;;  %v2727_v37 = vpack.c.bf16 %v501_v31, %v500_v29  ;;  %v2697_v38 = vpack.c.bf16 %v487_v33, %v486_v32  ;;  %v527_v28 = vld [vmem:[#allocation6 + $0xe28] sm:$0xff]  ;;  %v558_v29 = vld [vmem:[#allocation6 + $0xf20] sm:$0xff]  ;;  %v544_v32 = vld [vmem:[#allocation6 + $0xeb0] sm:$0xff] }
  0xec   :  { %2708 = vmatpush3.bf16.msra.mxu1 %v2707_v39  ;;  %2678 = vmatprep.subr.bf16.mxu0 %v2677_v40  ;;  %v470_v39 = vld [vmem:[#allocation6 + $0xc60] sm:$0xff]  ;;  %v471_v40 = vld [vmem:[#allocation6 + $0xc68] sm:$0xff]  ;;  %v545_v33 = vld [vmem:[#allocation6 + $0xeb8] sm:$0xff] }
  0xed   :  { %2710 = vmatprep.subr.bf16.mxu1 %v2709_v44  ;;  %1490 = vmatprep.mubr.f32.mxu0 %v67_v50  ;;  %v488_v44 = vld [vmem:[#allocation6 + $0xcf0] sm:$0xff]  ;;  %v2699_v48 = vpack.c.bf16 %v471_v40, %v470_v39  ;;  %v559_v31 = vld [vmem:[#allocation6 + $0xf28] sm:$0xff]  ;;  %v529_v40 = vld [vmem:[#allocation6 + $0xe38] sm:$0xff] }
  0xee   :  { %1560 = vmatprep.mubr.f32.mxu1 %v69_v52  ;;  %v2701_v50 = vpack.c.bf16 %v489_v45, %v488_v44  ;;  %v473_v52 = vld [vmem:[#allocation6 + $0xc78] sm:$0xff]  ;;  %v528_v39 = vld [vmem:[#allocation6 + $0xe30] sm:$0xff]  ;;  %v546_v44 = vld [vmem:[#allocation6 + $0xec0] sm:$0xff] }
  0xef   :  { %2680 = vmatpush3.bf16.msra.mxu0 %v2679_v51  ;;  %v472_v51 = vld [vmem:[#allocation6 + $0xc70] sm:$0xff]  ;;  %v547_v45 = vld [vmem:[#allocation6 + $0xec8] sm:$0xff] }
  0xf0   :  { %2712 = vmatpush3.bf16.msra.mxu1 %v2711_v53  ;;  %2682 = vmatprep.subr.bf16.mxu0 %v2681_v54  ;;  %v504_v53 = vld [vmem:[#allocation6 + $0xd70] sm:$0xff]  ;;  %v2733_v54 = vpack.c.bf16 %v521_v47, %v520_v46  ;;  %v2703_v60 = vpack.c.bf16 %v473_v52, %v472_v51  ;;  %v578_v46 = vld [vmem:[#allocation6 + $0xfc0] sm:$0xff]  ;;  %v579_v47 = vld [vmem:[#allocation6 + $0xfc8] sm:$0xff] }
  0xf1   :  { %2714 = vmatprep.subr.bf16.mxu1 %v2713_v58  ;;  %v570_v58 = vld [vmem:[#allocation6 + $0xf80] sm:$0xff]  ;;  %v2735_v61 = vpack.c.bf16 %v505_v55, %v504_v53  ;;  %v531_v52 = vld [vmem:[#allocation6 + $0xe48] sm:$0xff] }
  0xf2   :  { %v530_v51 = vld [vmem:[#allocation6 + $0xe40] sm:$0xff]  ;;  %v563_v55 = vld [vmem:[#allocation6 + $0xf48] sm:$0xff] }
  0xf3   :  { %2684 = vmatpush3.bf16.msra.mxu0 %v2683_v0  ;;  %v523_v0 = vld [vmem:[#allocation6 + $0xe08] sm:$0xff]  ;;  %v562_v53 = vld [vmem:[#allocation6 + $0xf40] sm:$0xff] }
  0xf4   :  { %2716 = vmatpush3.bf16.msra.mxu1 %v2715_v1  ;;  %2686 = vmatprep.subr.bf16.mxu0 %v2685_v2  ;;  %v554_v1 = vld [vmem:[#allocation6 + $0xf00] sm:$0xff]  ;;  %v2769_v2 = vpack.c.bf16 %v571_v59, %v570_v58  ;;  %v2739_v9 = vpack.c.bf16 %v523_v0, %v522_v63  ;;  %v580_v58 = vld [vmem:[#allocation6 + $0xfd0] sm:$0xff]  ;;  %v581_v59 = vld [vmem:[#allocation6 + $0xfd8] sm:$0xff] }
  0xf5   :  { %2718 = vmatprep.subr.bf16.mxu1 %v2717_v6  ;;  %v572_v6 = vld [vmem:[#allocation6 + $0xf90] sm:$0xff]  ;;  %v2771_v11 = vpack.c.bf16 %v555_v3, %v554_v1  ;;  %v533_v0 = vld [vmem:[#allocation6 + $0xe58] sm:$0xff] }
  0xf6   :  { %v2773_v16 = vpack.c.bf16 %v573_v7, %v572_v6  ;;  %v532_v63 = vld [vmem:[#allocation6 + $0xe50] sm:$0xff]  ;;  %v565_v3 = vld [vmem:[#allocation6 + $0xf58] sm:$0xff]  ;;  %v582_v6 = vld [vmem:[#allocation6 + $0xfe0] sm:$0xff] }
  0xf7   :  { %2688 = vmatpush3.bf16.msra.mxu0 %v2687_v12  ;;  %v2741_v12 = vpack.c.bf16 %v541_v5, %v540_v4  ;;  %v564_v1 = vld [vmem:[#allocation6 + $0xf50] sm:$0xff]  ;;  %v550_v4 = vld [vmem:[#allocation6 + $0xee0] sm:$0xff]  ;;  %v551_v5 = vld [vmem:[#allocation6 + $0xee8] sm:$0xff] }
  0xf8   :  { %2720 = vmatpush3.bf16.msra.mxu1 %v2719_v13  ;;  %2690 = vmatprep.subr.bf16.mxu0 %v2689_v14  ;;  %v524_v13 = vld [vmem:[#allocation6 + $0xe10] sm:$0xff]  ;;  %v525_v14 = vld [vmem:[#allocation6 + $0xe18] sm:$0xff]  ;;  %v583_v7 = vld [vmem:[#allocation6 + $0xfe8] sm:$0xff] }
  0xf9   :  { %2722 = vmatprep.subr.bf16.mxu1 %v2721_v18  ;;  %v542_v18 = vld [vmem:[#allocation6 + $0xea0] sm:$0xff]  ;;  %v2743_v23 = vpack.c.bf16 %v525_v14, %v524_v13 }
  0xfa   :  { %v566_v13 = vld [vmem:[#allocation6 + $0xf60] sm:$0xff] }
  0xfb   :  { %2692 = vmatpush3.bf16.msra.mxu0 %v2691_v24  ;;  %v73_v24 = vld [vmem:[#allocation3 + $0xf8] sm:$0xff] }
  0xfc   :  { %2724 = vmatpush3.bf16.msra.mxu1 %v2723_v25  ;;  %2694 = vmatprep.subr.bf16.mxu0 %v2693_v26  ;;  %v2775_v25 = vpack.c.bf16 %v557_v17, %v556_v15  ;;  %v2745_v26 = vpack.c.bf16 %v543_v19, %v542_v18  ;;  %v2793_v15 = vpack.c.bf16 %v583_v7, %v582_v6  ;;  %v552_v17 = vld [vmem:[#allocation6 + $0xef0] sm:$0xff]  ;;  %v553_v18 = vld [vmem:[#allocation6 + $0xef8] sm:$0xff] }
  0xfd   :  { %2726 = vmatprep.subr.bf16.mxu1 %v2725_v30  ;;  %v2777_v30 = vpack.c.bf16 %v575_v21, %v574_v20  ;;  %v584_v21 = vld [vmem:[#allocation6 + $0xff0] sm:$0xff] }
  0xff   :  { %2696 = vmatpush3.bf16.msra.mxu0 %v2695_v36  ;;  %v2747_v36 = vpack.c.bf16 %v527_v28, %v526_v27  ;;  %v2765_v28 = vpack.c.bf16 %v553_v18, %v552_v17 }
 0x100   :  { %2728 = vmatpush3.bf16.msra.mxu1 %v2727_v37  ;;  %2698 = vmatprep.subr.bf16.mxu0 %v2697_v38  ;;  %v2779_v37 = vpack.c.bf16 %v559_v31, %v558_v29  ;;  %v2749_v38 = vpack.c.bf16 %v545_v33, %v544_v32  ;;  %v536_v29 = vld [vmem:[#allocation6 + $0xe70] sm:$0xff]  ;;  %v569_v33 = vld [vmem:[#allocation6 + $0xf78] sm:$0xff] }
 0x101   :  { %2730 = vmatprep.subr.bf16.mxu1 %v2729_v42  ;;  %v2781_v42 = vpack.c.bf16 %v577_v35, %v576_v34  ;;  %v568_v32 = vld [vmem:[#allocation6 + $0xf70] sm:$0xff] }
 0x103   :  { %2700 = vmatpush3.bf16.msra.mxu0 %v2699_v48  ;;  %v2751_v48 = vpack.c.bf16 %v529_v40, %v528_v39 }
 0x104   :  { %2732 = vmatpush3.bf16.msra.mxu1 %v2731_v49  ;;  %2702 = vmatprep.subr.bf16.mxu0 %v2701_v50  ;;  %v2783_v49 = vpack.c.bf16 %v561_v43, %v560_v41  ;;  %v2753_v50 = vpack.c.bf16 %v547_v45, %v546_v44 }
 0x105   :  { %2734 = vmatprep.subr.bf16.mxu1 %v2733_v54  ;;  %v2785_v54 = vpack.c.bf16 %v579_v47, %v578_v46 }
 0x107   :  { %2704 = vmatpush3.bf16.msra.mxu0 %v2703_v60  ;;  %v2755_v60 = vpack.c.bf16 %v531_v52, %v530_v51 }
 0x108   :  { %2736 = vmatpush3.bf16.msra.mxu1 %v2735_v61  ;;  %2738 = vmatprep.subr.bf16.mxu0 %v2737_v62  ;;  %v2787_v61 = vpack.c.bf16 %v563_v55, %v562_v53  ;;  %v2757_v62 = vpack.c.bf16 %v549_v57, %v548_v56 }
 0x109   :  { %2770 = vmatprep.subr.bf16.mxu1 %v2769_v2  ;;  %v2789_v2 = vpack.c.bf16 %v581_v59, %v580_v58 }
 0x10a   :  { %1491 = vmatmul.mubr.f32.vlgmr.msra.gmra.mrb[12].mxu0 %v66_v8  ;;  %v2759_v8 = vpack.c.bf16 %v533_v0, %v532_v63 }
 0x10b   :  { %2740 = vmatpush3.bf16.msra.mxu0 %v2739_v9  ;;  %1561 = vmatmul.mubr.f32.vlgmr.msra.gmra.mrb[12].mxu1 %v68_v10  ;;  %v2791_v9 = vpack.c.bf16 %v565_v3, %v564_v1  ;;  %v2761_v10 = vpack.c.bf16 %v551_v5, %v550_v4 }
 0x10c   :  { %2772 = vmatpush3.bf16.msra.mxu1 %v2771_v11  ;;  %2742 = vmatprep.subr.bf16.mxu0 %v2741_v12  ;;  %v534_v11 = vld [vmem:[#allocation6 + $0xe60] sm:$0xff]  ;;  %v535_v12 = vld [vmem:[#allocation6 + $0xe68] sm:$0xff] }
 0x10d   :  { %2774 = vmatprep.subr.bf16.mxu1 %v2773_v16  ;;  %1630 = vmatprep.mubr.f32.mxu0 %v71_v22  ;;  %v567_v16 = vld [vmem:[#allocation6 + $0xf68] sm:$0xff]  ;;  %v585_v22 = vld [vmem:[#allocation6 + $0xff8] sm:$0xff] }
 0x10e   :  { %1700 = vmatprep.mubr.f32.mxu1 %v73_v24  ;;  %v2795_v27 = vpack.c.bf16 %v567_v16, %v566_v13  ;;  %v2797_v31 = vpack.c.bf16 %v585_v22, %v584_v21 }
 0x10f   :  { %2744 = vmatpush3.bf16.msra.mxu0 %v2743_v23 }
 0x110   :  { %2776 = vmatpush3.bf16.msra.mxu1 %v2775_v25  ;;  %2746 = vmatprep.subr.bf16.mxu0 %v2745_v26  ;;  %v2763_v25 = vpack.c.bf16 %v535_v12, %v534_v11 }
 0x111   :  { %2778 = vmatprep.subr.bf16.mxu1 %v2777_v30  ;;  %v537_v30 = vld [vmem:[#allocation6 + $0xe78] sm:$0xff] }
 0x112   :  { %v2767_v35 = vpack.c.bf16 %v537_v30, %v536_v29  ;;  %v1707_v30 = vstv %s2953_s2 }
 0x113   :  { %2748 = vmatpush3.bf16.msra.mxu0 %v2747_v36  ;;  %v2799_v36 = vpack.c.bf16 %v569_v33, %v568_v32  ;;  %v2884_v32 = vmov 0.0  }
 0x114   :  { %2780 = vmatpush3.bf16.msra.mxu1 %v2779_v37  ;;  %2750 = vmatprep.subr.bf16.mxu0 %v2749_v38  ;;  %v70_v37 = vld [vmem:[#allocation3 + $0xe0] sm:$0xff]  ;;  %v72_v38 = vld [vmem:[#allocation3 + $0xf0] sm:$0xff] }
 0x115   :  { %2782 = vmatprep.subr.bf16.mxu1 %v2781_v42 }
 0x117   :  { %2752 = vmatpush3.bf16.msra.mxu0 %v2751_v48 }
 0x118   :  { %2784 = vmatpush3.bf16.msra.mxu1 %v2783_v49  ;;  %2754 = vmatprep.subr.bf16.mxu0 %v2753_v50 }
 0x119   :  { %2786 = vmatprep.subr.bf16.mxu1 %v2785_v54 }
 0x11b   :  { %2756 = vmatpush3.bf16.msra.mxu0 %v2755_v60 }
 0x11c   :  { %2788 = vmatpush3.bf16.msra.mxu1 %v2787_v61  ;;  %2758 = vmatprep.subr.bf16.mxu0 %v2757_v62 }
 0x11d   :  { %v1761_v14 = vpop.f32.mrb[0].mxu0  ;;  %2790 = vmatprep.subr.bf16.mxu1 %v2789_v2 }
 0x11e   :  { %v1796_v19 = vpop.f32.mrb[0].mxu1  ;;  %v1762_v20 = vpop.f32.mrb[1].mxu0 }
 0x11f   :  { %v1763_v23 = vadd.f32 %v1762_v20, %v1761_v14  ;;  %v1797_v24 = vpop.f32.mrb[1].mxu1  ;;  %2760 = vmatpush3.bf16.msra.mxu0 %v2759_v8 }
 0x120   :  { %v1798_v26 = vadd.f32 %v1797_v24, %v1796_v19  ;;  %2792 = vmatpush3.bf16.msra.mxu1 %v2791_v9  ;;  %2762 = vmatprep.subr.bf16.mxu0 %v2761_v10 }
 0x121   :  { %2794 = vmatprep.subr.bf16.mxu1 %v2793_v15 }
 0x122   :  { %v723_v34 = vadd.f32 %v1798_v26, %v1763_v23 }
 0x123   :  { %2764 = vmatpush3.bf16.msra.mxu0 %v2763_v25 }
 0x124   :  { %2796 = vmatpush3.bf16.msra.mxu1 %v2795_v27  ;;  %2766 = vmatprep.subr.bf16.mxu0 %v2765_v28 }
 0x125   :  { %2798 = vmatprep.subr.bf16.mxu1 %v2797_v31 }
 0x127   :  { %2768 = vmatpush3.bf16.msra.mxu0 %v2767_v35 }
 0x128   :  { %2800 = vmatpush3.bf16.msra.mxu1 %v2799_v36 }
 0x12a   :  { %1631 = vmatmul.mubr.f32.vlgmr.msra.gmra.mrb[14].mxu0 %v70_v37 }
 0x12b   :  { %1701 = vmatmul.mubr.f32.vlgmr.msra.gmra.mrb[14].mxu1 %v72_v38 }
 0x13d   :  { %v1831_v39 = vpop.f32.mrb[2].mxu0 }
 0x13e   :  { %v1832_v40 = vpop.f32.mrb[3].mxu0  ;;  %v1866_v41 = vpop.f32.mrb[2].mxu1 }
 0x13f   :  { %v1833_v42 = vadd.f32 %v1832_v40, %v1831_v39  ;;  %v1867_v43 = vpop.f32.mrb[3].mxu1 }
 0x140   :  { %v1868_v44 = vadd.f32 %v1867_v43, %v1866_v41 }
 0x141   :  { %v793_v45 = vadd.f32 %v1833_v42, %v723_v34 }
 0x143   :  { %v863_v46 = vadd.f32 %v1868_v44, %v793_v45 }
 0x15d   :  { %v1901_v47 = vpop.f32.mrb[4].mxu0 }
 0x15e   :  { %v1902_v48 = vpop.f32.mrb[5].mxu0  ;;  %v1936_v49 = vpop.f32.mrb[4].mxu1 }
 0x15f   :  { %v1903_v50 = vadd.f32 %v1902_v48, %v1901_v47  ;;  %v1937_v51 = vpop.f32.mrb[5].mxu1 }
 0x160   :  { %v1938_v52 = vadd.f32 %v1937_v51, %v1936_v49 }
 0x161   :  { %v933_v53 = vadd.f32 %v1903_v50, %v863_v46 }
 0x163   :  { %v1003_v54 = vadd.f32 %v1938_v52, %v933_v53 }
 0x17d   :  { %v1971_v55 = vpop.f32.mrb[6].mxu0 }
 0x17e   :  { %v1972_v56 = vpop.f32.mrb[7].mxu0  ;;  %v2006_v57 = vpop.f32.mrb[6].mxu1 }
 0x17f   :  { %v1973_v58 = vadd.f32 %v1972_v56, %v1971_v55  ;;  %v2007_v59 = vpop.f32.mrb[7].mxu1 }
 0x180   :  { %v2008_v60 = vadd.f32 %v2007_v59, %v2006_v57 }
 0x181   :  { %v1073_v61 = vadd.f32 %v1973_v58, %v1003_v54 }
 0x183   :  { %v1143_v62 = vadd.f32 %v2008_v60, %v1073_v61 }
 0x19d   :  { %v2041_v63 = vpop.f32.mrb[8].mxu0 }
 0x19e   :  { %v2042_v0 = vpop.f32.mrb[9].mxu0  ;;  %v2076_v1 = vpop.f32.mrb[8].mxu1 }
 0x19f   :  { %v2043_v2 = vadd.f32 %v2042_v0, %v2041_v63  ;;  %v2077_v3 = vpop.f32.mrb[9].mxu1 }
 0x1a0   :  { %v2078_v4 = vadd.f32 %v2077_v3, %v2076_v1 }
 0x1a1   :  { %v1213_v5 = vadd.f32 %v2043_v2, %v1143_v62 }
 0x1a3   :  { %v1283_v6 = vadd.f32 %v2078_v4, %v1213_v5 }
 0x1bd   :  { %v2111_v7 = vpop.f32.mrb[10].mxu0 }
 0x1be   :  { %v2112_v8 = vpop.f32.mrb[11].mxu0  ;;  %v2146_v9 = vpop.f32.mrb[10].mxu1 }
 0x1bf   :  { %v2113_v10 = vadd.f32 %v2112_v8, %v2111_v7  ;;  %v2147_v11 = vpop.f32.mrb[11].mxu1 }
 0x1c0   :  { %v2148_v12 = vadd.f32 %v2147_v11, %v2146_v9 }
 0x1c1   :  { %v1353_v13 = vadd.f32 %v2113_v10, %v1283_v6 }
 0x1c3   :  { %v1423_v14 = vadd.f32 %v2148_v12, %v1353_v13 }
 0x1dd   :  { %v2181_v15 = vpop.f32.mrb[12].mxu0 }
 0x1de   :  { %v2182_v16 = vpop.f32.mrb[13].mxu0  ;;  %v2216_v17 = vpop.f32.mrb[12].mxu1 }
 0x1df   :  { %v2183_v18 = vadd.f32 %v2182_v16, %v2181_v15  ;;  %v2217_v19 = vpop.f32.mrb[13].mxu1 }
 0x1e0   :  { %v2218_v20 = vadd.f32 %v2217_v19, %v2216_v17 }
 0x1e1   :  { %v1493_v21 = vadd.f32 %v2183_v18, %v1423_v14 }
 0x1e3   :  { %v1563_v22 = vadd.f32 %v2218_v20, %v1493_v21 }
 0x1fd   :  { %v2251_v23 = vpop.f32.mrb[14].mxu0 }
 0x1fe   :  { %v2252_v24 = vpop.f32.mrb[15].mxu0  ;;  %v2286_v25 = vpop.f32.mrb[14].mxu1 }
 0x1ff   :  { %v2253_v26 = vadd.f32 %v2252_v24, %v2251_v23  ;;  %v2287_v27 = vpop.f32.mrb[15].mxu1 }
 0x200   :  { %v2288_v28 = vadd.f32 %v2287_v27, %v2286_v25 }
 0x201   :  { %v1633_v29 = vadd.f32 %v2253_v26, %v1563_v22 }
 0x203   :  { %v1703_v31 = vadd.f32 %v2288_v28, %v1633_v29 }
 0x205   :  { %vm1708_vm0 = vcmp.ge.f32.partialorder %v1703_v31, %v1707_v30 }
 0x206   :  { %v1728_v33 = vsel %vm1708_vm0, 1.0, %v2884_v32 }
 0x207   :  { %1711 = vst [vmem:[#allocation8] sm:$0xff] %v1728_v33 }
 0x208   :  { %2862 = shalt.err (!%p2859_p6)
}
 0x209   :  { %s2863_s16 = scalar_lea.hbm %s2954_s3, 128 }
 0x20a   :  { %p2864_p7 = scmp.ne.s32.totalorder %s2954_s3, %s2863_s16  ;;  %p2867_p8 = scmp.lt.u32.totalorder %s2863_s16, %s2954_s3 }
 0x20c   :  { %p2869_p9 = pnand %p2867_p8, %p2864_p7 }
 0x20e   :  { %2872 = shalt.err (!%p2869_p9)
}
 0x20f   :  { %1721 = dma.vmem_to_hbm [thread:$0]  %s1719_s12, 128, %s2954_s3, [#allocation5]  }
 0x210   :  { %2877 = dma.done.wait [#allocation5], 128  }
 0x211   :  { %2878 = vsyncadd [#allocation5], 4294967168 }
 0x212   :  { %1725 = vsyncpa [#allocation4], 1 }
 0x213   :  { %1726 = vsyncpa [#allocation7], 1 }
 0x214   :  { %1727 = vsyncpa [#allocation5], 1 }

</bundles_post_ra>
